<compile_context>
chip_gen: v7x
topology: tpu7x:2x2x1
jax: 0.10.0
libtpu: 0.0.40
codegen_flags: <defaults>
</compile_context>

<pallas_src>
import jax
import jax.numpy as jnp
from jax.experimental import pallas as pl
from jax.experimental.pallas import tpu as pltpu

# ---------------- static module configuration (mirrors __init__ args) -------
GGC_OUT = 65            # gated_graph_conv_args['out_channels']
GGC_LAYERS = 2          # gated_graph_conv_args['num_layers']
EMB = 57                # emb_size == data.x feature dim
C_IN = 4                # conv1d_1 in_channels  (nodes per graph after .view)
C1 = 8                  # conv1d_1 out_channels, kernel_size=3, padding=1
K1 = 3
C2 = 50                 # conv1d_2 out_channels, kernel_size=1
MP1_K, MP1_S = 3, 2     # maxpool1d_1
MP2_K, MP2_S = 2, 2     # maxpool1d_2
FC1_SIZE = 1500         # hardcoded in Conv.__init__

B = 2                   # graphs per batch
N = B * C_IN            # total nodes
NUM_EDGES = 16

H = GGC_OUT
H3 = 3 * H

L_Z = GGC_OUT + EMB                                 # concat length   = 122
L_Y = GGC_OUT                                       # hidden length   = 65
LM1_Z = (L_Z - MP1_K) // MP1_S + 1                  # 60
LM2_Z = (LM1_Z - MP2_K) // MP2_S + 1                # 30
LM1_Y = (L_Y - MP1_K) // MP1_S + 1                  # 32
LM2_Y = (LM1_Y - MP2_K) // MP2_S + 1                # 16


def get_conv_mp_out_size(in_size, out_channels, mps):
    size = in_size
    for k, s in mps:
        size = round((size - k) / s + 1)
    size = size + 1 if size % 2 != 0 else size
    return int(size * out_channels)


FC2_SIZE = get_conv_mp_out_size(GGC_OUT, C2, [(MP1_K, MP1_S), (MP2_K, MP2_S)])
assert C2 * LM2_Z == FC1_SIZE, "fc1 size mismatch with conv pipeline"
assert C2 * LM2_Y == FC2_SIZE, "fc2 size mismatch with conv pipeline"

# Lane-batched conv-head layout: segments [Z(g0), Z(g1), Y(g0), Y(g1)], each
# zero padded by 1 column on both sides (conv1d_1 padding=1).
SEG_LENS = (L_Z,) * B + (L_Y,) * B
PAD_LENS = tuple(L + 2 for L in SEG_LENS)
PAD_OFF = tuple(sum(PAD_LENS[:i]) for i in range(len(PAD_LENS)))
PAD_TOT = sum(PAD_LENS)                             # 382
CW = PAD_TOT - 2                                    # conv1 output width = 380

# Pool striding is folded into host-expanded fc weights read at stride 4 on
# the max(c[l], c[l+2]) lattice (everything exact f32).
EXP_Z = L_Z - 4                                     # 118
EXP_Y = L_Y - 4                                     # 61
assert 4 * (LM2_Z - 1) + 2 <= L_Z - 3 and 4 * (LM2_Z - 1) <= EXP_Z - 1
assert 4 * (LM2_Y - 1) + 2 <= L_Y - 3 and 4 * (LM2_Y - 1) <= EXP_Y - 1

# column offsets inside the packed conv/fc head slab [C2 + C1, HEAD_COLS]
_B2_OFF = C1                                        # 8
_FC1W_OFF = _B2_OFF + 1                             # 9
_FC2W_OFF = _FC1W_OFF + EXP_Z                       # 127
_FC1B_OFF = _FC2W_OFF + EXP_Y                       # 188
_FC2B_OFF = _FC1B_OFF + 1                           # 189
HEAD_COLS = _FC2B_OFF + 1                           # 190


# ---------------------------- fused Pallas kernel ----------------------------
def net_kernel(x_ref, a_ref, ggc_ref, head_ref, out_ref, p_scr):
    """Fused GatedGraphConv (2 layers) + conv head + fc product + sigmoid."""
    f32 = jnp.float32

    def wdot(u, v):                      # weight matmul, default MXU precision
        return jnp.dot(u, v, preferred_element_type=f32)

    xp = x_ref[...]                      # [N, H]   x zero-padded to H (host)
    av = a_ref[...]                      # [N, N]   dense adjacency (dst, src)

    # ------------------------- GatedGraphConv -------------------------------
    h = xp                               # h0 = [x | 0]  (exact, no matmul/mask)
    for l in range(GGC_LAYERS):          # static unroll
        wg_blk = ggc_ref[3 * l]          # [H+1, 3H], W_l in [0:H, 0:H]
        wi_blk = ggc_ref[3 * l + 1]      # rows 0:H = [W_ir|W_iz|W_in], row H = bias
        wh_blk = ggc_ref[3 * l + 2]      # rows 0:H = [W_hr|W_hz|W_hn], row H = bias
        m = wdot(av, wdot(h, wg_blk[0:H, 0:H]))          # sum aggregation
        gi = wdot(m, wi_blk[0:H, :]) + wi_blk[H:H + 1, :]
        gh = wdot(h, wh_blk[0:H, :]) + wh_blk[H:H + 1, :]
        r = jax.nn.sigmoid(gi[:, 0:H] + gh[:, 0:H])
        z = jax.nn.sigmoid(gi[:, H:2 * H] + gh[:, H:2 * H])
        n = jnp.tanh(gi[:, 2 * H:3 * H] + r * gh[:, 2 * H:3 * H])
        h = (1.0 - z) * n + z * h

    # --------------------- conv/fc head parameter slab ----------------------
    head = head_ref[...]                              # [C2 + C1, HEAD_COLS]
    w2 = head[0:C2, 0:C1]                             # [50, 8]
    b2 = head[0:C2, _B2_OFF:_B2_OFF + 1]              # [50, 1]
    fc1w_exp = head[0:C2, _FC1W_OFF:_FC1W_OFF + EXP_Z]
    fc2w_exp = head[0:C2, _FC2W_OFF:_FC2W_OFF + EXP_Y]
    fc1b = head[0:1, _FC1B_OFF:_FC1B_OFF + 1]         # [1, 1]
    fc2b = head[0:1, _FC2B_OFF:_FC2B_OFF + 1]         # [1, 1]
    w1 = head[C2:C2 + C1, 0:K1 * C_IN]                # [8, 12] (tap-major cols)
    b1 = head[C2:C2 + C1, K1 * C_IN:K1 * C_IN + 1]    # [8, 1]

    # ------ assemble the lane-batched, zero-padded conv input in scratch -----
    # layout: [0|h(g0)|x(g0)|0, 0|h(g1)|x(g1)|0, 0|h(g0)|0, 0|h(g1)|0]
    p_scr[...] = jnp.zeros((C_IN, PAD_TOT), f32)
    for b in range(B):                                 # Z inputs: cat([hidden, x], 1)
        off = PAD_OFF[b]
        p_scr[:, off + 1:off + 1 + H] = h[b * C_IN:(b + 1) * C_IN, :]
        p_scr[:, off + 1 + H:off + 1 + H + EMB] = xp[b * C_IN:(b + 1) * C_IN, 0:EMB]
    for b in range(B):                                 # Y inputs: hidden only
        off = PAD_OFF[B + b]
        p_scr[:, off + 1:off + 1 + H] = h[b * C_IN:(b + 1) * C_IN, :]
    P = p_scr[...]                                     # [C_IN, PAD_TOT]

    # conv1d_1 (k=3, padding=1) on all 4 pipelines at once: 3 tap matmuls
    z1 = wdot(w1[:, 0:C_IN], P[:, 0:CW])
    z1 = z1 + wdot(w1[:, C_IN:2 * C_IN], P[:, 1:1 + CW])
    z1 = z1 + wdot(w1[:, 2 * C_IN:3 * C_IN], P[:, 2:2 + CW])
    z1 = jnp.maximum(z1 + b1, 0.0)                     # ReLU, [C1, CW]

    # maxpool1d(3, 2): sliding max-of-3 on the whole batch; the stride-2
    # selection is deferred (columns between segments are never read later).
    r3 = jnp.maximum(jnp.maximum(z1[:, 0:CW - 2], z1[:, 1:CW - 1]), z1[:, 2:CW])

    # conv1d_2 (k=1) commutes with the (pure selection) pooling strides.
    c2f = wdot(w2, r3) + b2                            # [C2, CW - 2]

    # maxpool1d(2, 2) on the stride-2 lattice == max(c2f[l], c2f[l+2]); the
    # final stride-4 selection is folded into the host-expanded fc weights.
    m2 = jnp.maximum(c2f[:, 0:CW - 4], c2f[:, 2:CW - 2])   # [C2, CW - 4]

    for b in range(B):                                 # per-graph fc + sigmoid
        zo, yo = PAD_OFF[b], PAD_OFF[B + b]
        fz = jnp.sum(m2[:, zo:zo + EXP_Z] * fc1w_exp, keepdims=True) + fc1b
        fy = jnp.sum(m2[:, yo:yo + EXP_Y] * fc2w_exp, keepdims=True) + fc2b
        out_ref[0:1, b:b + 1] = jax.nn.sigmoid(fz * fy)     # lane-slice store


# ------------------------------ wrapper --------------------------------------
@jax.jit
def net_forward(x, A, packed):
    xp = jnp.pad(x, ((0, 0), (0, H - EMB)))            # GGC zero-extension (exact)
    out = pl.pallas_call(
        net_kernel,
        out_shape=jax.ShapeDtypeStruct((1, B), jnp.float32),
        in_specs=[pl.BlockSpec(memory_space=pltpu.MemorySpace.VMEM)
                  for _ in range(4)],
        out_specs=pl.BlockSpec(memory_space=pltpu.MemorySpace.VMEM),
        scratch_shapes=[pltpu.VMEM((C_IN, PAD_TOT), jnp.float32)],
    )(xp, A, packed['ggc'], packed['head'])
    return out.reshape(B)                              # flatten


# --------------------------- pure-JAX reference ------------------------------
def reference_forward(x, A, p):
    h = jnp.pad(x, ((0, 0), (0, H - EMB)))
    for l in range(GGC_LAYERS):
        m = A @ (h @ p['wg'][l])
        r = jax.nn.sigmoid(m @ p['wir'][l] + p['bir'][l]
                           + h @ p['whr'][l] + p['bhr'][l])
        z = jax.nn.sigmoid(m @ p['wiz'][l] + p['biz'][l]
                           + h @ p['whz'][l] + p['bhz'][l])
        n = jnp.tanh(m @ p['win'][l] + p['bin'][l]
                     + r * (h @ p['whn'][l] + p['bhn'][l]))
        h = (1.0 - z) * n + z * h
    hidden = h

    def pipe(inp):                                   # inp: [B, C_IN, L]
        L = inp.shape[-1]
        xpd = jnp.pad(inp, ((0, 0), (0, 0), (1, 1)))
        conv1 = sum(jnp.einsum('oc,bcl->bol', p['w1'][k], xpd[:, :, k:k + L])
                    for k in range(K1))
        z1 = jax.nn.relu(conv1 + p['b1'][None])
        r3 = jnp.maximum(jnp.maximum(z1[:, :, 0:L - 2], z1[:, :, 1:L - 1]),
                         z1[:, :, 2:L])
        lm1 = (L - MP1_K) // MP1_S + 1
        p1 = r3[:, :, ::MP1_S][:, :, :lm1]
        c2 = jnp.einsum('oc,bcl->bol', p['w2'], p1) + p['b2'][None]
        r2 = jnp.maximum(c2[:, :, 0:lm1 - 1], c2[:, :, 1:lm1])
        lm2 = (lm1 - MP2_K) // MP2_S + 1
        return r2[:, :, ::MP2_S][:, :, :lm2]

    concat = jnp.concatenate([hidden, x], axis=1).reshape(B, C_IN, L_Z)
    Zf = pipe(concat).reshape(B, -1)
    Yf = pipe(hidden.reshape(B, C_IN, L_Y)).reshape(B, -1)
    fz = jnp.sum(Zf * p['fc1w'].reshape(1, -1), axis=1) + p['fc1b']
    fy = jnp.sum(Yf * p['fc2w'].reshape(1, -1), axis=1) + p['fc2b']
    return jax.nn.sigmoid(fz * fy)


# ------------------------------ params ---------------------------------------
def init_params(key):
    ks = jax.random.split(key, 21)
    nrm = lambda k, shp, s: (s * jax.random.normal(k, shp)).astype(jnp.float32)
    return {
        # GatedGraphConv per-layer linear
        'wg':  nrm(ks[0], (GGC_LAYERS, H, H), 0.1),
        # GRUCell weights (already transposed for right-multiplication)
        'wir': nrm(ks[1], (GGC_LAYERS, H, H), 0.1),
        'wiz': nrm(ks[2], (GGC_LAYERS, H, H), 0.1),
        'win': nrm(ks[3], (GGC_LAYERS, H, H), 0.1),
        'whr': nrm(ks[4], (GGC_LAYERS, H, H), 0.1),
        'whz': nrm(ks[5], (GGC_LAYERS, H, H), 0.1),
        'whn': nrm(ks[6], (GGC_LAYERS, H, H), 0.1),
        'bir': nrm(ks[7], (GGC_LAYERS, 1, H), 0.1),
        'biz': nrm(ks[8], (GGC_LAYERS, 1, H), 0.1),
        'bin': nrm(ks[9], (GGC_LAYERS, 1, H), 0.1),
        'bhr': nrm(ks[10], (GGC_LAYERS, 1, H), 0.1),
        'bhz': nrm(ks[11], (GGC_LAYERS, 1, H), 0.1),
        'bhn': nrm(ks[12], (GGC_LAYERS, 1, H), 0.1),
        # conv1d_1 weight stored as [k, out, in]; conv1d_2 is 1x1
        'w1':  nrm(ks[13], (K1, C1, C_IN), 0.2),
        'b1':  nrm(ks[14], (C1, 1), 0.2),
        'w2':  nrm(ks[15], (C2, C1), 0.2),
        'b2':  nrm(ks[16], (C2, 1), 0.2),
        # fc weights in the flatten order [C2, L] of Z/Y
        'fc1w': nrm(ks[17], (C2, LM2_Z), 0.02),
        'fc1b': nrm(ks[18], (), 0.02),
        'fc2w': nrm(ks[19], (C2, LM2_Y), 0.02),
        'fc2b': nrm(ks[20], (), 0.02),
    }


def pack_params(p):
    """One-time packing (outside the hot path): only 2 parameter slabs."""
    f32 = jnp.float32
    # GGC slab [3*GGC_LAYERS, H+1, 3H]: per layer
    #   3l+0: per-layer linear W_l in [0:H, 0:H]
    #   3l+1: rows 0:H = [W_ir|W_iz|W_in], row H = packed input bias
    #   3l+2: rows 0:H = [W_hr|W_hz|W_hn], row H = packed hidden bias
    blocks = []
    for l in range(GGC_LAYERS):
        wg_blk = jnp.zeros((H + 1, H3), f32).at[0:H, 0:H].set(p['wg'][l])
        wi = jnp.concatenate([p['wir'][l], p['wiz'][l], p['win'][l]], axis=1)
        bi = jnp.concatenate([p['bir'][l], p['biz'][l], p['bin'][l]], axis=1)
        wh = jnp.concatenate([p['whr'][l], p['whz'][l], p['whn'][l]], axis=1)
        bh = jnp.concatenate([p['bhr'][l], p['bhz'][l], p['bhn'][l]], axis=1)
        blocks += [wg_blk,
                   jnp.concatenate([wi, bi], axis=0),
                   jnp.concatenate([wh, bh], axis=0)]
    ggc = jnp.stack(blocks, axis=0)                    # [6, 66, 195]

    # conv/fc head slab [C2 + C1, HEAD_COLS]
    #   rows 0:C2 : [w2 | b2 | fc1w expanded (stride-4 lattice) | fc2w expanded
    #               | fc1b | fc2b]
    #   rows C2:  : [conv1 weight (tap-major) | conv1 bias | zero pad]
    fc1w_exp = jnp.zeros((C2, EXP_Z), f32).at[:, 0::4].set(p['fc1w'])
    fc2w_exp = jnp.zeros((C2, EXP_Y), f32).at[:, 0::4].set(p['fc2w'])
    fc1b_col = jnp.zeros((C2, 1), f32).at[0, 0].set(p['fc1b'])
    fc2b_col = jnp.zeros((C2, 1), f32).at[0, 0].set(p['fc2b'])
    conv2_rows = jnp.concatenate(
        [p['w2'], p['b2'], fc1w_exp, fc2w_exp, fc1b_col, fc2b_col], axis=1)
    w1_flat = jnp.transpose(p['w1'], (1, 0, 2)).reshape(C1, K1 * C_IN)
    conv1_rows = jnp.concatenate(
        [w1_flat, p['b1'],
         jnp.zeros((C1, HEAD_COLS - (K1 * C_IN + 1)), f32)], axis=1)
    head = jnp.concatenate([conv2_rows, conv1_rows], axis=0)   # [58, 190]
    assert ggc.shape == (3 * GGC_LAYERS, H + 1, H3)
    assert head.shape == (C2 + C1, HEAD_COLS)
    return {'ggc': ggc, 'head': head}


# ------------------------------ setup / main ---------------------------------
if __name__ == "__main__":
    key = jax.random.PRNGKey(0)
    k_x, k_e, k_p = jax.random.split(key, 3)

    # data.x : [N, EMB] node features ; edge_index : [2, E]
    x = jax.random.normal(k_x, (N, EMB), jnp.float32)
    edge_index = jax.random.randint(k_e, (2, NUM_EDGES), 0, N)
    src, dst = edge_index[0], edge_index[1]
    # dense adjacency: A[i, j] = #edges j -> i, so A @ m == sum aggregation
    A = jnp.zeros((N, N), jnp.float32).at[dst, src].add(1.0)

    params = init_params(k_p)
    packed = pack_params(params)

    out = jax.block_until_ready(net_forward(x, A, packed))
    ref = reference_forward(x, A, params)

    if out.shape != (B,) or not bool(jnp.all(jnp.isfinite(out))):
        raise RuntimeError("bad kernel output")
    if not bool(jnp.allclose(out, ref, atol=3e-3, rtol=3e-3)):
        raise RuntimeError(f"kernel/reference mismatch: {out} vs {ref}")
    print("KERNEL_OK")
</pallas_src>

<mosaic_0001>
module attributes {stable_mosaic.version = 11 : i64} {
  func.func @net_kernel(%arg0: memref<8x65xf32, #tpu.memory_space<vmem>>, %arg1: memref<8x8xf32, #tpu.memory_space<vmem>>, %arg2: memref<6x66x195xf32, #tpu.memory_space<vmem>>, %arg3: memref<58x190xf32, #tpu.memory_space<vmem>>, %arg4: memref<1x2xf32, #tpu.memory_space<vmem>>, %arg5: memref<4x382xf32, #tpu.memory_space<vmem>>) attributes {dimension_semantics = [], scalar_prefetch = 0 : i64, scratch_operands = 1 : i64, tpu.core_type = #tpu.core_type<tc>} {
    %c0 = arith.constant 0 : index
    %c0_0 = arith.constant 0 : index
    %0 = vector.load %arg0[%c0, %c0_0] : memref<8x65xf32, #tpu.memory_space<vmem>>, vector<8x65xf32>
    %c0_1 = arith.constant 0 : index
    %c0_2 = arith.constant 0 : index
    %1 = vector.load %arg1[%c0_1, %c0_2] : memref<8x8xf32, #tpu.memory_space<vmem>>, vector<8x8xf32>
    %c0_3 = arith.constant 0 : index
    %c0_4 = arith.constant 0 : index
    %c0_5 = arith.constant 0 : index
    %2 = vector.load %arg2[%c0_3, %c0_4, %c0_5] : memref<6x66x195xf32, #tpu.memory_space<vmem>>, vector<1x66x195xf32>
    %3 = vector.shape_cast %2 : vector<1x66x195xf32> to vector<66x195xf32>
    %c1 = arith.constant 1 : index
    %c0_6 = arith.constant 0 : index
    %c0_7 = arith.constant 0 : index
    %4 = vector.load %arg2[%c1, %c0_6, %c0_7] : memref<6x66x195xf32, #tpu.memory_space<vmem>>, vector<1x66x195xf32>
    %5 = vector.shape_cast %4 : vector<1x66x195xf32> to vector<66x195xf32>
    %c2 = arith.constant 2 : index
    %c0_8 = arith.constant 0 : index
    %c0_9 = arith.constant 0 : index
    %6 = vector.load %arg2[%c2, %c0_8, %c0_9] : memref<6x66x195xf32, #tpu.memory_space<vmem>>, vector<1x66x195xf32>
    %7 = vector.shape_cast %6 : vector<1x66x195xf32> to vector<66x195xf32>
    %8 = vector.extract_strided_slice %3 {offsets = [0, 0], sizes = [65, 65], strides = [1, 1]} : vector<66x195xf32> to vector<65x65xf32>
    %cst = arith.constant dense<0.000000e+00> : vector<8x65xf32>
    %9 = tpu.matmul %0, %8, %cst {dimension_numbers = #tpu.dot_dimension_numbers<[1], [0], [0], [1], [0, 0, 1, 1], [], []>} : vector<8x65xf32>, vector<65x65xf32>, vector<8x65xf32> -> vector<8x65xf32>
    %cst_10 = arith.constant dense<0.000000e+00> : vector<8x65xf32>
    %10 = tpu.matmul %1, %9, %cst_10 {dimension_numbers = #tpu.dot_dimension_numbers<[1], [0], [0], [1], [0, 0, 1, 1], [], []>} : vector<8x8xf32>, vector<8x65xf32>, vector<8x65xf32> -> vector<8x65xf32>
    %11 = vector.extract_strided_slice %5 {offsets = [0, 0], sizes = [65, 195], strides = [1, 1]} : vector<66x195xf32> to vector<65x195xf32>
    %cst_11 = arith.constant dense<0.000000e+00> : vector<8x195xf32>
    %12 = tpu.matmul %10, %11, %cst_11 {dimension_numbers = #tpu.dot_dimension_numbers<[1], [0], [0], [1], [0, 0, 1, 1], [], []>} : vector<8x65xf32>, vector<65x195xf32>, vector<8x195xf32> -> vector<8x195xf32>
    %13 = vector.extract_strided_slice %5 {offsets = [65, 0], sizes = [1, 195], strides = [1, 1]} : vector<66x195xf32> to vector<1x195xf32>
    %14 = vector.broadcast %13 : vector<1x195xf32> to vector<8x195xf32>
    %15 = arith.addf %12, %14 : vector<8x195xf32>
    %16 = vector.extract_strided_slice %7 {offsets = [0, 0], sizes = [65, 195], strides = [1, 1]} : vector<66x195xf32> to vector<65x195xf32>
    %cst_12 = arith.constant dense<0.000000e+00> : vector<8x195xf32>
    %17 = tpu.matmul %0, %16, %cst_12 {dimension_numbers = #tpu.dot_dimension_numbers<[1], [0], [0], [1], [0, 0, 1, 1], [], []>} : vector<8x65xf32>, vector<65x195xf32>, vector<8x195xf32> -> vector<8x195xf32>
    %18 = vector.extract_strided_slice %7 {offsets = [65, 0], sizes = [1, 195], strides = [1, 1]} : vector<66x195xf32> to vector<1x195xf32>
    %19 = vector.broadcast %18 : vector<1x195xf32> to vector<8x195xf32>
    %20 = arith.addf %17, %19 : vector<8x195xf32>
    %21 = vector.extract_strided_slice %15 {offsets = [0, 0], sizes = [8, 65], strides = [1, 1]} : vector<8x195xf32> to vector<8x65xf32>
    %22 = vector.extract_strided_slice %20 {offsets = [0, 0], sizes = [8, 65], strides = [1, 1]} : vector<8x195xf32> to vector<8x65xf32>
    %23 = arith.addf %21, %22 : vector<8x65xf32>
    %24 = arith.negf %23 : vector<8x65xf32>
    %25 = math.exp %24 : vector<8x65xf32>
    %cst_13 = arith.constant 1.000000e+00 : f32
    %26 = vector.broadcast %cst_13 : f32 to vector<8x65xf32>
    %27 = arith.addf %26, %25 : vector<8x65xf32>
    %28 = arith.divf %26, %27 : vector<8x65xf32>
    %29 = vector.extract_strided_slice %15 {offsets = [0, 65], sizes = [8, 65], strides = [1, 1]} : vector<8x195xf32> to vector<8x65xf32>
    %30 = vector.extract_strided_slice %20 {offsets = [0, 65], sizes = [8, 65], strides = [1, 1]} : vector<8x195xf32> to vector<8x65xf32>
    %31 = arith.addf %29, %30 : vector<8x65xf32>
    %32 = arith.negf %31 : vector<8x65xf32>
    %33 = math.exp %32 : vector<8x65xf32>
    %cst_14 = arith.constant 1.000000e+00 : f32
    %34 = vector.broadcast %cst_14 : f32 to vector<8x65xf32>
    %35 = arith.addf %34, %33 : vector<8x65xf32>
    %36 = arith.divf %34, %35 : vector<8x65xf32>
    %37 = vector.extract_strided_slice %15 {offsets = [0, 130], sizes = [8, 65], strides = [1, 1]} : vector<8x195xf32> to vector<8x65xf32>
    %38 = vector.extract_strided_slice %20 {offsets = [0, 130], sizes = [8, 65], strides = [1, 1]} : vector<8x195xf32> to vector<8x65xf32>
    %39 = arith.mulf %28, %38 : vector<8x65xf32>
    %40 = arith.addf %37, %39 : vector<8x65xf32>
    %41 = math.tanh %40 : vector<8x65xf32>
    %cst_15 = arith.constant 1.000000e+00 : f32
    %42 = vector.broadcast %cst_15 : f32 to vector<8x65xf32>
    %43 = arith.subf %42, %36 : vector<8x65xf32>
    %44 = arith.mulf %43, %41 : vector<8x65xf32>
    %45 = arith.mulf %36, %0 : vector<8x65xf32>
    %46 = arith.addf %44, %45 : vector<8x65xf32>
    %c3 = arith.constant 3 : index
    %c0_16 = arith.constant 0 : index
    %c0_17 = arith.constant 0 : index
    %47 = vector.load %arg2[%c3, %c0_16, %c0_17] : memref<6x66x195xf32, #tpu.memory_space<vmem>>, vector<1x66x195xf32>
    %48 = vector.shape_cast %47 : vector<1x66x195xf32> to vector<66x195xf32>
    %c4 = arith.constant 4 : index
    %c0_18 = arith.constant 0 : index
    %c0_19 = arith.constant 0 : index
    %49 = vector.load %arg2[%c4, %c0_18, %c0_19] : memref<6x66x195xf32, #tpu.memory_space<vmem>>, vector<1x66x195xf32>
    %50 = vector.shape_cast %49 : vector<1x66x195xf32> to vector<66x195xf32>
    %c5 = arith.constant 5 : index
    %c0_20 = arith.constant 0 : index
    %c0_21 = arith.constant 0 : index
    %51 = vector.load %arg2[%c5, %c0_20, %c0_21] : memref<6x66x195xf32, #tpu.memory_space<vmem>>, vector<1x66x195xf32>
    %52 = vector.shape_cast %51 : vector<1x66x195xf32> to vector<66x195xf32>
    %53 = vector.extract_strided_slice %48 {offsets = [0, 0], sizes = [65, 65], strides = [1, 1]} : vector<66x195xf32> to vector<65x65xf32>
    %cst_22 = arith.constant dense<0.000000e+00> : vector<8x65xf32>
    %54 = tpu.matmul %46, %53, %cst_22 {dimension_numbers = #tpu.dot_dimension_numbers<[1], [0], [0], [1], [0, 0, 1, 1], [], []>} : vector<8x65xf32>, vector<65x65xf32>, vector<8x65xf32> -> vector<8x65xf32>
    %cst_23 = arith.constant dense<0.000000e+00> : vector<8x65xf32>
    %55 = tpu.matmul %1, %54, %cst_23 {dimension_numbers = #tpu.dot_dimension_numbers<[1], [0], [0], [1], [0, 0, 1, 1], [], []>} : vector<8x8xf32>, vector<8x65xf32>, vector<8x65xf32> -> vector<8x65xf32>
    %56 = vector.extract_strided_slice %50 {offsets = [0, 0], sizes = [65, 195], strides = [1, 1]} : vector<66x195xf32> to vector<65x195xf32>
    %cst_24 = arith.constant dense<0.000000e+00> : vector<8x195xf32>
    %57 = tpu.matmul %55, %56, %cst_24 {dimension_numbers = #tpu.dot_dimension_numbers<[1], [0], [0], [1], [0, 0, 1, 1], [], []>} : vector<8x65xf32>, vector<65x195xf32>, vector<8x195xf32> -> vector<8x195xf32>
    %58 = vector.extract_strided_slice %50 {offsets = [65, 0], sizes = [1, 195], strides = [1, 1]} : vector<66x195xf32> to vector<1x195xf32>
    %59 = vector.broadcast %58 : vector<1x195xf32> to vector<8x195xf32>
    %60 = arith.addf %57, %59 : vector<8x195xf32>
    %61 = vector.extract_strided_slice %52 {offsets = [0, 0], sizes = [65, 195], strides = [1, 1]} : vector<66x195xf32> to vector<65x195xf32>
    %cst_25 = arith.constant dense<0.000000e+00> : vector<8x195xf32>
    %62 = tpu.matmul %46, %61, %cst_25 {dimension_numbers = #tpu.dot_dimension_numbers<[1], [0], [0], [1], [0, 0, 1, 1], [], []>} : vector<8x65xf32>, vector<65x195xf32>, vector<8x195xf32> -> vector<8x195xf32>
    %63 = vector.extract_strided_slice %52 {offsets = [65, 0], sizes = [1, 195], strides = [1, 1]} : vector<66x195xf32> to vector<1x195xf32>
    %64 = vector.broadcast %63 : vector<1x195xf32> to vector<8x195xf32>
    %65 = arith.addf %62, %64 : vector<8x195xf32>
    %66 = vector.extract_strided_slice %60 {offsets = [0, 0], sizes = [8, 65], strides = [1, 1]} : vector<8x195xf32> to vector<8x65xf32>
    %67 = vector.extract_strided_slice %65 {offsets = [0, 0], sizes = [8, 65], strides = [1, 1]} : vector<8x195xf32> to vector<8x65xf32>
    %68 = arith.addf %66, %67 : vector<8x65xf32>
    %69 = arith.negf %68 : vector<8x65xf32>
    %70 = math.exp %69 : vector<8x65xf32>
    %cst_26 = arith.constant 1.000000e+00 : f32
    %71 = vector.broadcast %cst_26 : f32 to vector<8x65xf32>
    %72 = arith.addf %71, %70 : vector<8x65xf32>
    %73 = arith.divf %71, %72 : vector<8x65xf32>
    %74 = vector.extract_strided_slice %60 {offsets = [0, 65], sizes = [8, 65], strides = [1, 1]} : vector<8x195xf32> to vector<8x65xf32>
    %75 = vector.extract_strided_slice %65 {offsets = [0, 65], sizes = [8, 65], strides = [1, 1]} : vector<8x195xf32> to vector<8x65xf32>
    %76 = arith.addf %74, %75 : vector<8x65xf32>
    %77 = arith.negf %76 : vector<8x65xf32>
    %78 = math.exp %77 : vector<8x65xf32>
    %cst_27 = arith.constant 1.000000e+00 : f32
    %79 = vector.broadcast %cst_27 : f32 to vector<8x65xf32>
    %80 = arith.addf %79, %78 : vector<8x65xf32>
    %81 = arith.divf %79, %80 : vector<8x65xf32>
    %82 = vector.extract_strided_slice %60 {offsets = [0, 130], sizes = [8, 65], strides = [1, 1]} : vector<8x195xf32> to vector<8x65xf32>
    %83 = vector.extract_strided_slice %65 {offsets = [0, 130], sizes = [8, 65], strides = [1, 1]} : vector<8x195xf32> to vector<8x65xf32>
    %84 = arith.mulf %73, %83 : vector<8x65xf32>
    %85 = arith.addf %82, %84 : vector<8x65xf32>
    %86 = math.tanh %85 : vector<8x65xf32>
    %cst_28 = arith.constant 1.000000e+00 : f32
    %87 = vector.broadcast %cst_28 : f32 to vector<8x65xf32>
    %88 = arith.subf %87, %81 : vector<8x65xf32>
    %89 = arith.mulf %88, %86 : vector<8x65xf32>
    %90 = arith.mulf %81, %46 : vector<8x65xf32>
    %91 = arith.addf %89, %90 : vector<8x65xf32>
    %c0_29 = arith.constant 0 : index
    %c0_30 = arith.constant 0 : index
    %92 = vector.load %arg3[%c0_29, %c0_30] : memref<58x190xf32, #tpu.memory_space<vmem>>, vector<58x190xf32>
    %93 = vector.extract_strided_slice %92 {offsets = [0, 0], sizes = [50, 8], strides = [1, 1]} : vector<58x190xf32> to vector<50x8xf32>
    %94 = vector.extract_strided_slice %92 {offsets = [0, 8], sizes = [50, 1], strides = [1, 1]} : vector<58x190xf32> to vector<50x1xf32>
    %95 = vector.extract_strided_slice %92 {offsets = [0, 9], sizes = [50, 118], strides = [1, 1]} : vector<58x190xf32> to vector<50x118xf32>
    %96 = vector.extract_strided_slice %92 {offsets = [0, 127], sizes = [50, 61], strides = [1, 1]} : vector<58x190xf32> to vector<50x61xf32>
    %97 = vector.extract_strided_slice %92 {offsets = [0, 188], sizes = [1, 1], strides = [1, 1]} : vector<58x190xf32> to vector<1x1xf32>
    %98 = vector.extract_strided_slice %92 {offsets = [0, 189], sizes = [1, 1], strides = [1, 1]} : vector<58x190xf32> to vector<1x1xf32>
    %99 = vector.extract_strided_slice %92 {offsets = [50, 0], sizes = [8, 12], strides = [1, 1]} : vector<58x190xf32> to vector<8x12xf32>
    %100 = vector.extract_strided_slice %92 {offsets = [50, 12], sizes = [8, 1], strides = [1, 1]} : vector<58x190xf32> to vector<8x1xf32>
    %cst_31 = arith.constant 0.000000e+00 : f32
    %101 = vector.broadcast %cst_31 : f32 to vector<4x382xf32>
    %c0_32 = arith.constant 0 : index
    %c0_33 = arith.constant 0 : index
    %102 = vector.load %arg5[%c0_32, %c0_33] : memref<4x382xf32, #tpu.memory_space<vmem>>, vector<4x382xf32>
    tpu.vector_store %arg5[%c0_32, %c0_33], %101 {strides = array<i32>} : memref<4x382xf32, #tpu.memory_space<vmem>>, vector<4x382xf32>,
    %103 = vector.extract_strided_slice %91 {offsets = [0, 0], sizes = [4, 65], strides = [1, 1]} : vector<8x65xf32> to vector<4x65xf32>
    %c0_34 = arith.constant 0 : index
    %c1_35 = arith.constant 1 : index
    %104 = vector.load %arg5[%c0_34, %c1_35] : memref<4x382xf32, #tpu.memory_space<vmem>>, vector<4x65xf32>
    tpu.vector_store %arg5[%c0_34, %c1_35], %103 {strides = array<i32>} : memref<4x382xf32, #tpu.memory_space<vmem>>, vector<4x65xf32>,
    %105 = vector.extract_strided_slice %0 {offsets = [0, 0], sizes = [4, 57], strides = [1, 1]} : vector<8x65xf32> to vector<4x57xf32>
    %c0_36 = arith.constant 0 : index
    %c66 = arith.constant 66 : index
    %106 = vector.load %arg5[%c0_36, %c66] : memref<4x382xf32, #tpu.memory_space<vmem>>, vector<4x57xf32>
    tpu.vector_store %arg5[%c0_36, %c66], %105 {strides = array<i32>} : memref<4x382xf32, #tpu.memory_space<vmem>>, vector<4x57xf32>,
    %107 = vector.extract_strided_slice %91 {offsets = [4, 0], sizes = [4, 65], strides = [1, 1]} : vector<8x65xf32> to vector<4x65xf32>
    %c0_37 = arith.constant 0 : index
    %c125 = arith.constant 125 : index
    %108 = vector.load %arg5[%c0_37, %c125] : memref<4x382xf32, #tpu.memory_space<vmem>>, vector<4x65xf32>
    tpu.vector_store %arg5[%c0_37, %c125], %107 {strides = array<i32>} : memref<4x382xf32, #tpu.memory_space<vmem>>, vector<4x65xf32>,
    %109 = vector.extract_strided_slice %0 {offsets = [4, 0], sizes = [4, 57], strides = [1, 1]} : vector<8x65xf32> to vector<4x57xf32>
    %c0_38 = arith.constant 0 : index
    %c190 = arith.constant 190 : index
    %110 = vector.load %arg5[%c0_38, %c190] : memref<4x382xf32, #tpu.memory_space<vmem>>, vector<4x57xf32>
    tpu.vector_store %arg5[%c0_38, %c190], %109 {strides = array<i32>} : memref<4x382xf32, #tpu.memory_space<vmem>>, vector<4x57xf32>,
    %111 = vector.extract_strided_slice %91 {offsets = [0, 0], sizes = [4, 65], strides = [1, 1]} : vector<8x65xf32> to vector<4x65xf32>
    %c0_39 = arith.constant 0 : index
    %c249 = arith.constant 249 : index
    %112 = vector.load %arg5[%c0_39, %c249] : memref<4x382xf32, #tpu.memory_space<vmem>>, vector<4x65xf32>
    tpu.vector_store %arg5[%c0_39, %c249], %111 {strides = array<i32>} : memref<4x382xf32, #tpu.memory_space<vmem>>, vector<4x65xf32>,
    %113 = vector.extract_strided_slice %91 {offsets = [4, 0], sizes = [4, 65], strides = [1, 1]} : vector<8x65xf32> to vector<4x65xf32>
    %c0_40 = arith.constant 0 : index
    %c316 = arith.constant 316 : index
    %114 = vector.load %arg5[%c0_40, %c316] : memref<4x382xf32, #tpu.memory_space<vmem>>, vector<4x65xf32>
    tpu.vector_store %arg5[%c0_40, %c316], %113 {strides = array<i32>} : memref<4x382xf32, #tpu.memory_space<vmem>>, vector<4x65xf32>,
    %c0_41 = arith.constant 0 : index
    %c0_42 = arith.constant 0 : index
    %115 = vector.load %arg5[%c0_41, %c0_42] : memref<4x382xf32, #tpu.memory_space<vmem>>, vector<4x382xf32>
    %116 = vector.extract_strided_slice %99 {offsets = [0, 0], sizes = [8, 4], strides = [1, 1]} : vector<8x12xf32> to vector<8x4xf32>
    %117 = vector.extract_strided_slice %115 {offsets = [0, 0], sizes = [4, 380], strides = [1, 1]} : vector<4x382xf32> to vector<4x380xf32>
    %cst_43 = arith.constant dense<0.000000e+00> : vector<8x380xf32>
    %118 = tpu.matmul %116, %117, %cst_43 {dimension_numbers = #tpu.dot_dimension_numbers<[1], [0], [0], [1], [0, 0, 1, 1], [], []>} : vector<8x4xf32>, vector<4x380xf32>, vector<8x380xf32> -> vector<8x380xf32>
    %119 = vector.extract_strided_slice %99 {offsets = [0, 4], sizes = [8, 4], strides = [1, 1]} : vector<8x12xf32> to vector<8x4xf32>
    %120 = vector.extract_strided_slice %115 {offsets = [0, 1], sizes = [4, 380], strides = [1, 1]} : vector<4x382xf32> to vector<4x380xf32>
    %cst_44 = arith.constant dense<0.000000e+00> : vector<8x380xf32>
    %121 = tpu.matmul %119, %120, %cst_44 {dimension_numbers = #tpu.dot_dimension_numbers<[1], [0], [0], [1], [0, 0, 1, 1], [], []>} : vector<8x4xf32>, vector<4x380xf32>, vector<8x380xf32> -> vector<8x380xf32>
    %122 = arith.addf %118, %121 : vector<8x380xf32>
    %123 = vector.extract_strided_slice %99 {offsets = [0, 8], sizes = [8, 4], strides = [1, 1]} : vector<8x12xf32> to vector<8x4xf32>
    %124 = vector.extract_strided_slice %115 {offsets = [0, 2], sizes = [4, 380], strides = [1, 1]} : vector<4x382xf32> to vector<4x380xf32>
    %cst_45 = arith.constant dense<0.000000e+00> : vector<8x380xf32>
    %125 = tpu.matmul %123, %124, %cst_45 {dimension_numbers = #tpu.dot_dimension_numbers<[1], [0], [0], [1], [0, 0, 1, 1], [], []>} : vector<8x4xf32>, vector<4x380xf32>, vector<8x380xf32> -> vector<8x380xf32>
    %126 = arith.addf %122, %125 : vector<8x380xf32>
    %127 = vector.broadcast %100 : vector<8x1xf32> to vector<8x380xf32>
    %128 = arith.addf %126, %127 : vector<8x380xf32>
    %cst_46 = arith.constant 0.000000e+00 : f32
    %129 = vector.broadcast %cst_46 : f32 to vector<8x380xf32>
    %130 = arith.maximumf %128, %129 : vector<8x380xf32>
    %131 = vector.extract_strided_slice %130 {offsets = [0, 0], sizes = [8, 378], strides = [1, 1]} : vector<8x380xf32> to vector<8x378xf32>
    %132 = vector.extract_strided_slice %130 {offsets = [0, 1], sizes = [8, 378], strides = [1, 1]} : vector<8x380xf32> to vector<8x378xf32>
    %133 = arith.maximumf %131, %132 : vector<8x378xf32>
    %134 = vector.extract_strided_slice %130 {offsets = [0, 2], sizes = [8, 378], strides = [1, 1]} : vector<8x380xf32> to vector<8x378xf32>
    %135 = arith.maximumf %133, %134 : vector<8x378xf32>
    %cst_47 = arith.constant dense<0.000000e+00> : vector<50x378xf32>
    %136 = tpu.matmul %93, %135, %cst_47 {dimension_numbers = #tpu.dot_dimension_numbers<[1], [0], [0], [1], [0, 0, 1, 1], [], []>} : vector<50x8xf32>, vector<8x378xf32>, vector<50x378xf32> -> vector<50x378xf32>
    %137 = vector.broadcast %94 : vector<50x1xf32> to vector<50x378xf32>
    %138 = arith.addf %136, %137 : vector<50x378xf32>
    %139 = vector.extract_strided_slice %138 {offsets = [0, 0], sizes = [50, 376], strides = [1, 1]} : vector<50x378xf32> to vector<50x376xf32>
    %140 = vector.extract_strided_slice %138 {offsets = [0, 2], sizes = [50, 376], strides = [1, 1]} : vector<50x378xf32> to vector<50x376xf32>
    %141 = arith.maximumf %139, %140 : vector<50x376xf32>
    %142 = vector.extract_strided_slice %141 {offsets = [0, 0], sizes = [50, 118], strides = [1, 1]} : vector<50x376xf32> to vector<50x118xf32>
    %143 = arith.mulf %142, %95 : vector<50x118xf32>
    %144 = vector.shape_cast %143 : vector<50x118xf32> to vector<1x50x118xf32>
    %cst_48 = arith.constant dense<0.000000e+00> : vector<1xf32>
    %145 = vector.multi_reduction <add>, %144, %cst_48 [1, 2] : vector<1x50x118xf32> to vector<1xf32>
    %146 = vector.shape_cast %145 : vector<1xf32> to vector<1x1x1xf32>
    %147 = vector.extract %146[0, 0, 0] : f32 from vector<1x1x1xf32>
    %148 = vector.broadcast %147 : f32 to vector<1x1xf32>
    %149 = arith.addf %148, %97 : vector<1x1xf32>
    %150 = vector.extract_strided_slice %141 {offsets = [0, 248], sizes = [50, 61], strides = [1, 1]} : vector<50x376xf32> to vector<50x61xf32>
    %151 = arith.mulf %150, %96 : vector<50x61xf32>
    %152 = vector.shape_cast %151 : vector<50x61xf32> to vector<1x50x61xf32>
    %cst_49 = arith.constant dense<0.000000e+00> : vector<1xf32>
    %153 = vector.multi_reduction <add>, %152, %cst_49 [1, 2] : vector<1x50x61xf32> to vector<1xf32>
    %154 = vector.shape_cast %153 : vector<1xf32> to vector<1x1x1xf32>
    %155 = vector.extract %154[0, 0, 0] : f32 from vector<1x1x1xf32>
    %156 = vector.broadcast %155 : f32 to vector<1x1xf32>
    %157 = arith.addf %156, %98 : vector<1x1xf32>
    %158 = arith.mulf %149, %157 : vector<1x1xf32>
    %159 = arith.negf %158 : vector<1x1xf32>
    %160 = math.exp %159 : vector<1x1xf32>
    %cst_50 = arith.constant 1.000000e+00 : f32
    %161 = vector.broadcast %cst_50 : f32 to vector<1x1xf32>
    %162 = arith.addf %161, %160 : vector<1x1xf32>
    %163 = arith.divf %161, %162 : vector<1x1xf32>
    %c0_51 = arith.constant 0 : index
    %c0_52 = arith.constant 0 : index
    %164 = vector.load %arg4[%c0_51, %c0_52] : memref<1x2xf32, #tpu.memory_space<vmem>>, vector<1x1xf32>
    tpu.vector_store %arg4[%c0_51, %c0_52], %163 {strides = array<i32>} : memref<1x2xf32, #tpu.memory_space<vmem>>, vector<1x1xf32>,
    %165 = vector.extract_strided_slice %141 {offsets = [0, 124], sizes = [50, 118], strides = [1, 1]} : vector<50x376xf32> to vector<50x118xf32>
    %166 = arith.mulf %165, %95 : vector<50x118xf32>
    %167 = vector.shape_cast %166 : vector<50x118xf32> to vector<1x50x118xf32>
    %cst_53 = arith.constant dense<0.000000e+00> : vector<1xf32>
    %168 = vector.multi_reduction <add>, %167, %cst_53 [1, 2] : vector<1x50x118xf32> to vector<1xf32>
    %169 = vector.shape_cast %168 : vector<1xf32> to vector<1x1x1xf32>
    %170 = vector.extract %169[0, 0, 0] : f32 from vector<1x1x1xf32>
    %171 = vector.broadcast %170 : f32 to vector<1x1xf32>
    %172 = arith.addf %171, %97 : vector<1x1xf32>
    %173 = vector.extract_strided_slice %141 {offsets = [0, 315], sizes = [50, 61], strides = [1, 1]} : vector<50x376xf32> to vector<50x61xf32>
    %174 = arith.mulf %173, %96 : vector<50x61xf32>
    %175 = vector.shape_cast %174 : vector<50x61xf32> to vector<1x50x61xf32>
    %cst_54 = arith.constant dense<0.000000e+00> : vector<1xf32>
    %176 = vector.multi_reduction <add>, %175, %cst_54 [1, 2] : vector<1x50x61xf32> to vector<1xf32>
    %177 = vector.shape_cast %176 : vector<1xf32> to vector<1x1x1xf32>
    %178 = vector.extract %177[0, 0, 0] : f32 from vector<1x1x1xf32>
    %179 = vector.broadcast %178 : f32 to vector<1x1xf32>
    %180 = arith.addf %179, %98 : vector<1x1xf32>
    %181 = arith.mulf %172, %180 : vector<1x1xf32>
    %182 = arith.negf %181 : vector<1x1xf32>
    %183 = math.exp %182 : vector<1x1xf32>
    %cst_55 = arith.constant 1.000000e+00 : f32
    %184 = vector.broadcast %cst_55 : f32 to vector<1x1xf32>
    %185 = arith.addf %184, %183 : vector<1x1xf32>
    %186 = arith.divf %184, %185 : vector<1x1xf32>
    %c0_56 = arith.constant 0 : index
    %c1_57 = arith.constant 1 : index
    %187 = vector.load %arg4[%c0_56, %c1_57] : memref<1x2xf32, #tpu.memory_space<vmem>>, vector<1x1xf32>
    tpu.vector_store %arg4[%c0_56, %c1_57], %186 {strides = array<i32>} : memref<1x2xf32, #tpu.memory_space<vmem>>, vector<1x1xf32>,
    return
  }
}

</mosaic_0001>

<bundles_post_ra>
// kernel: net_forward.1
= control target key start
LH: loop header
LB: loop body
LE: loop exit
PB: predicated region body
PF: predicated region fallthrough
CT: control target
= control target key end

     0   :  { %9 = vsyncpa [#allocation4], 0  ;;  %s3536_s0 = inlined_call_operand.vmem [shape: f32[8,65], index: 0, kind: input, shape index: {}]   ;;  %s3537_s1 = inlined_call_operand.vmem [shape: f32[8,8], index: 1, kind: input, shape index: {}]   ;;  %s3538_s2 = inlined_call_operand.hbm [shape: f32[6,66,195], index: 2, kind: input, shape index: {}]   ;;  %s3539_s3 = inlined_call_operand.hbm [shape: f32[58,190], index: 3, kind: input, shape index: {}]   ;;  %s3540_s4 = inlined_call_operand.hbm [shape: f32[1,2], index: 4, kind: output, shape index: {}]  }
   0x1   :  { %10 = vsyncpa [#allocation7], 0 }
   0x2   :  { %11 = vsyncpa [#allocation5], 0  ;;  %s2737_s15 = smov [#allocation3]   ;;  %s2665_s19 = scalar_lea.hbm %s3538_s2, 13824 }
   0x3   :  { %s21_s16 = sshll.u32 %s2737_s15, 4  ;;  %p2666_p0 = scmp.ne.s32.totalorder %s3538_s2, %s2665_s19  ;;  %s22_s16 = int_to_ptr.vmem [resolvable:$true] %s21_s16 }
   0x4   :  { %p2669_p1 = scmp.lt.u32.totalorder %s2665_s19, %s3538_s2 }
   0x6   :  { %p2671_p2 = pnand %p2669_p1, %p2666_p0 }
   0x8   :  { %2674 = shalt.err (!%p2671_p2)
}
   0x9   :  { %s2675_s24 = scalar_lea.vmem %s22_s16, 13824  ;;  %p2680_p4 = scmp.lt.s32.totalorder %s22_s16, %s22_s16 }
   0xa   :  { %p2676_p3 = scmp.ne.s32.totalorder %s22_s16, %s2675_s24  ;;  %p2681_p5 = scmp.lt.s32.totalorder %s2675_s24, %s2675_s24 }
   0xc   :  { %p2682_p6 = por %p2681_p5, %p2680_p4 }
   0xe   :  { %p2683_p7 = pnand %p2682_p6, %p2676_p3 }
  0x10   :  { %2686 = shalt.err (!%p2683_p7)
}
  0x11   :  { %s2738_s25 = smov 256   ;;  %s2739_s26 = smov 16  }
  0x12   :  { %27 = dma.hbm_to_vmem [thread:$0]  %s3538_s2, 13824, %s22_s16, [#allocation4], %s2738_s25, %s2738_s25, %s2739_s26  }
  0x13   :  { %s2740_s29 = smov [#allocation6]   ;;  %s2687_s7 = scalar_lea.hbm %s3539_s3, 2048 }
  0x14   :  { %s33_s30 = sshll.u32 %s2740_s29, 4  ;;  %p2688_p8 = scmp.ne.s32.totalorder %s3539_s3, %s2687_s7  ;;  %s34_s30 = int_to_ptr.vmem [resolvable:$true] %s33_s30 }
  0x15   :  { %p2691_p9 = scmp.lt.u32.totalorder %s2687_s7, %s3539_s3 }
  0x17   :  { %p2693_p10 = pnand %p2691_p9, %p2688_p8 }
  0x19   :  { %2696 = shalt.err (!%p2693_p10)
}
  0x1a   :  { %s2697_s12 = scalar_lea.vmem %s34_s30, 2048  ;;  %p2702_p12 = scmp.lt.s32.totalorder %s34_s30, %s34_s30 }
  0x1b   :  { %p2698_p11 = scmp.ne.s32.totalorder %s34_s30, %s2697_s12  ;;  %p2703_p13 = scmp.lt.s32.totalorder %s2697_s12, %s2697_s12 }
  0x1d   :  { %p2704_p0 = por %p2703_p13, %p2702_p12 }
  0x1f   :  { %p2705_p1 = pnand %p2704_p0, %p2698_p11 }
  0x21   :  { %2708 = shalt.err (!%p2705_p1)
}
  0x22   :  { %39 = dma.hbm_to_vmem [thread:$0]  %s3539_s3, 2048, %s34_s30, [#allocation7], %s2738_s25, %s2738_s25, %s2739_s26  }
  0x23   :  { %2731 = dma.done.wait [#allocation4], 13824  }
  0x24   :  { %2732 = vsyncadd [#allocation4], 4294953472 }
  0x25   :  { %2733 = dma.done.wait [#allocation7], 2048  }
  0x26   :  { %2734 = vsyncadd [#allocation7], 4294965248  ;;  %v2741_v0 = vmov 0.0|0.0   ;;  %v2742_v1 = vmov 0.0   ;;  %vm2743_vm0 = vmmov 0   ;;  %v48_v2 = vld [vmem:[#allocation3] sm:$0xff] }
  0x27   :  { %2500 = vmatprep.subr.bf16.mxu0 %v2741_v0  ;;  %886 = vst [vmem:[#allocation2] sm:$0xff] %v2742_v1  ;;  %2428 = vmatprep.mubr.msk.f32.mxu0 %vm2743_vm0, %v2742_v1  ;;  %v49_v3 = vld [vmem:[#allocation3 + $0x10] sm:$0xff]  ;;  %v50_v4 = vld [vmem:[#allocation3 + $0x20] sm:$0xff]  ;;  %vm99_vm1 = vcmask 1040384   ;;  %vm95_vm2 = vcmask 531456   ;;  %v78_v16 = vld [vmem:[#allocation3 + $0x128] sm:$0xff] }
  0x28   :  { %2431 = vmatprep.subr.mxu1 %v2742_v1  ;;  %2433 = vmatprep.mubr.msk.f32.mxu1 %vm2743_vm0, %v2742_v1  ;;  %v2501_v5 = vpack.c.bf16 %v49_v3, %v48_v2  ;;  %v51_v6 = vld [vmem:[#allocation3 + $0x30] sm:$0xff]  ;;  %v52_v8 = vld [vmem:[#allocation3 + $0x40] sm:$0xff]  ;;  %v80_v17 = vld [vmem:[#allocation3 + $0x138] sm:$0xff]  ;;  %vm173_vm3 = vcmask 64512   ;;  %s2745_s16 = smov 2   ;;  %s2746_s17 = smov 63  }
  0x29   :  { %v2504_v7 = vpack.c.bf16 %v51_v6, %v50_v4  ;;  %v53_v9 = vld [vmem:[#allocation3 + $0x50] sm:$0xff]  ;;  %v54_v11 = vld [vmem:[#allocation3 + $0x60] sm:$0xff]  ;;  %v2528_v19 = vpack.c.bf16 %v80_v17, %v78_v16  ;;  %v82_v21 = vld [vmem:[#allocation3 + $0x148] sm:$0xff]  ;;  %s2747_s18 = smov 65   ;;  %vm514_vm4 = vcmask 515072   ;;  %vm887_vm5 = vcmask 1027072  }
  0x2a   :  { %2502 = vmatpush3.bf16.msra.mxu0 %v2501_v5  ;;  %v2507_v10 = vpack.c.bf16 %v53_v9, %v52_v8  ;;  %v55_v12 = vld [vmem:[#allocation3 + $0x70] sm:$0xff]  ;;  %v56_v14 = vld [vmem:[#allocation3 + $0x80] sm:$0x3]  ;;  %v2830_v15 = vld [vmem:[%s3536_s0] sm:$0xff]  ;;  %v247_v9 = vlaneseq  ;;  %888 = vst.msk [vmem:[#allocation2 + $0x8] sm:$0xf] %vm887_vm5, %v2742_v1 }
  0x2b   :  { %2503 = vmatprep.subr.bf16.mxu0 %v2741_v0  ;;  %v2510_v13 = vpack.c.bf16 %v55_v12, %v54_v11  ;;  %v77_v18 = vld [vmem:[#allocation3 + $0x120] sm:$0xff]  ;;  %v79_v20 = vld [vmem:[#allocation3 + $0x130] sm:$0xff]  ;;  %v84_v22 = vld [vmem:[#allocation3 + $0x158] sm:$0xff]  ;;  %s2748_s19 = smov 60   ;;  %s2749_s20 = smov 64   ;;  %vm895_vm6 = vcmask 523264  }
  0x2c   :  { %v2530_v23 = vpack.c.bf16 %v79_v20, %v77_v18  ;;  %v2532_v24 = vpack.c.bf16 %v84_v22, %v82_v21  ;;  %v81_v25 = vld [vmem:[#allocation3 + $0x140] sm:$0xff]  ;;  %v83_v26 = vld [vmem:[#allocation3 + $0x150] sm:$0xff]  ;;  %v86_v27 = vld [vmem:[#allocation3 + $0x168] sm:$0xff]  ;;  %s2750_s21 = smov 56   ;;  %s2751_s22 = smov 66   ;;  %vm912_vm7 = vcmask 1044456  }
  0x2d   :  { %v88_v28 = vld [vmem:[#allocation3 + $0x178] sm:$0xff]  ;;  %v2534_v29 = vpack.c.bf16 %v83_v26, %v81_v25  ;;  %v85_v31 = vld [vmem:[#allocation3 + $0x160] sm:$0xff]  ;;  %v87_v32 = vld [vmem:[#allocation3 + $0x170] sm:$0xff]  ;;  %s2752_s23 = smov 123   ;;  %s2753_s24 = smov 62   ;;  %vm913_vm8 = vcmask 506884  }
  0x2e   :  { %2505 = vmatpush3.bf16.msra.mxu0 %v2504_v7  ;;  %v2536_v30 = vpack.c.bf16 %v88_v28, %v86_v27  ;;  %v90_v33 = vld [vmem:[#allocation3 + $0x188] sm:$0xff]  ;;  %v92_v34 = vld [vmem:[#allocation3 + $0x198] sm:$0xff]  ;;  %v2538_v35 = vpack.c.bf16 %v87_v32, %v85_v31  ;;  %v89_v37 = vld [vmem:[#allocation3 + $0x180] sm:$0xff]  ;;  %vm898_vm9 = vcmask 535560   ;;  %vm909_vm10 = vcmask 490496   ;;  %s2754_s25 = smov 127  }
  0x2f   :  { %2506 = vmatprep.subr.bf16.mxu0 %v2741_v0  ;;  %v2540_v36 = vpack.c.bf16 %v92_v34, %v90_v33  ;;  %v91_v38 = vld [vmem:[#allocation3 + $0x190] sm:$0xff]  ;;  %v94_v40 = vld [vmem:[#allocation3 + $0x1a8] sm:$0x3]  ;;  %v2837_v41 = vld [vmem:[#allocation3 + $0x1a0] sm:$0x3]  ;;  %vm903_vm11 = vcmask 1003024  }
  0x30   :  { %v2542_v39 = vpack.c.bf16 %v91_v38, %v89_v37  ;;  %v59_v42 = vld [vmem:[#allocation3 + $0x98] sm:$0xff]  ;;  %v61_v43 = vld [vmem:[#allocation3 + $0xa8] sm:$0xff]  ;;  %v58_v44 = vld [vmem:[#allocation3 + $0x90] sm:$0xff]  ;;  %vm928_vm13 = vcmask 1044424   ;;  %vm929_vm14 = vcmask 474116   ;;  %vm925_vm15 = vcmask 457728  }
  0x31   :  { %v60_v45 = vld [vmem:[#allocation3 + $0xa0] sm:$0xff]  ;;  %v63_v46 = vld [vmem:[#allocation3 + $0xb8] sm:$0xff]  ;;  %v65_v47 = vld [vmem:[#allocation3 + $0xc8] sm:$0xff]  ;;  %v2512_v48 = vpack.c.bf16 %v61_v43, %v59_v42  ;;  %vm938_vm5 = vcmask 1019360   ;;  %s2755_s26 = smov 124   ;;  %s2757_s27 = smov 120  }
  0x32   :  { %2508 = vmatpush3.bf16.msra.mxu0 %v2507_v10  ;;  %v2849_v49 = vld [vmem:[%s3537_s1] sm:$0xff]  ;;  %v2514_v50 = vpack.c.bf16 %v60_v45, %v58_v44  ;;  %v2516_v52 = vpack.c.bf16 %v65_v47, %v63_v46  ;;  %v62_v53 = vld [vmem:[#allocation3 + $0xb0] sm:$0xff]  ;;  %v67_v56 = vld [vmem:[#allocation3 + $0xd8] sm:$0xff]  ;;  %v248_v10 = vshrl.u32 %v247_v9, 7  ;;  %s2744_s1 = smov 126   ;;  %s2759_s28 = smov 121  }
  0x33   :  { %2509 = vmatprep.subr.bf16.mxu0 %v2741_v0  ;;  %v64_v54 = vld [vmem:[#allocation3 + $0xc0] sm:$0xff]  ;;  %v69_v57 = vld [vmem:[#allocation3 + $0xe8] sm:$0xff]  ;;  %v66_v60 = vld [vmem:[#allocation3 + $0xd0] sm:$0xff]  ;;  %s2760_s29 = smov 115   ;;  %s2761_s30 = smov 119  }
  0x34   :  { %v2518_v58 = vpack.c.bf16 %v64_v54, %v62_v53  ;;  %v2520_v59 = vpack.c.bf16 %v69_v57, %v67_v56  ;;  %v68_v61 = vld [vmem:[#allocation3 + $0xe0] sm:$0xff]  ;;  %v71_v62 = vld [vmem:[#allocation3 + $0xf8] sm:$0xff]  ;;  %v73_v63 = vld [vmem:[#allocation3 + $0x108] sm:$0xff]  ;;  %v2857_v11 = vsub.s32 1, %v248_v10  ;;  %s2762_s5 = smov 8   ;;  %s2763_s6 = smov 69  }
  0x35   :  { %v2522_v2 = vpack.c.bf16 %v68_v61, %v66_v60  ;;  %v2524_v3 = vpack.c.bf16 %v73_v63, %v71_v62  ;;  %v70_v4 = vld [vmem:[#allocation3 + $0xf0] sm:$0xff]  ;;  %v72_v5 = vld [vmem:[#allocation3 + $0x100] sm:$0xff]  ;;  %v75_v7 = vld [vmem:[#allocation3 + $0x118] sm:$0x3]  ;;  %s2764_s7 = smov 4   ;;  %s2765_s12 = smov 68  }
  0x36   :  { %2511 = vmatpush3.bf16.msra.mxu0 %v2510_v13  ;;  %v2526_v6 = vpack.c.bf16 %v72_v5, %v70_v4  ;;  %v74_v8 = vld [vmem:[#allocation3 + $0x110] sm:$0x3]  ;;  %v342_v12 = vrot.slane %v94_v40, %v2857_v11  ;;  %v254_v32 = vrot.slane %v75_v7, %v2857_v11  ;;  %v462_v37 = vld [vmem:[#allocation3 + $0x1c0] sm:$0xff]  ;;  %vm914_vm12 = vmor %vm913_vm8, %vm912_vm7  ;;  %vm965_vm7 = vcmask 1043456   ;;  %s2766_s2 = smov [#allocation8]  }
  0x37   :  { %2426 = vmatprep.subr.mxu0 %v2742_v1  ;;  %v250_v20 = vrot.slane %v74_v8, %v2857_v11  ;;  %v463_v38 = vld [vmem:[#allocation3 + $0x1d0] sm:$0xff]  ;;  %v466_v44 = vld [vmem:[#allocation3 + $0x200] sm:$0xff]  ;;  %vm959_vm8 = vcmask 1039360   ;;  %s2309_s13 = sshll.u32 %s2766_s2, 4  ;;  %s2310_s13 = int_to_ptr.vmem [resolvable:$true] %s2309_s13 }
  0x38   :  { %v465_v43 = vld [vmem:[#allocation3 + $0x1f0] sm:$0xff]  ;;  %v468_v47 = vld [vmem:[#allocation3 + $0x220] sm:$0xff]  ;;  %s2709_s3 = scalar_lea.vmem %s2310_s13, 16  ;;  %s2713_s14 = scalar_lea.vmem %s2310_s13, 32 }
  0x39   :  { %v2551_v45 = vpack.c.bf16 %v466_v44, %v465_v43  ;;  %v467_v46 = vld [vmem:[#allocation3 + $0x210] sm:$0xff]  ;;  %v496_v44 = vld [vmem:[#allocation3 + $0x300] sm:$0xff]  ;;  %p2710_p2 = scmp.ne.s32.totalorder %s2310_s13, %s2709_s3  ;;  %p2714_p3 = scmp.lt.s32.totalorder %s2310_s13, %s2310_s13 }
  0x3a   :  { %2427 = vmatpush3.msk.msra.mxu0 %vm99_vm1, %v56_v14  ;;  %v469_v54 = vld [vmem:[#allocation3 + $0x230] sm:$0x3]  ;;  %p2715_p4 = scmp.lt.s32.totalorder %s2713_s14, %s2709_s3 }
  0x3b   :  { %2429 = vmatmul.mubr.msk.f32.vlgmr.msra.gmra.mrb[0].mxu0 %vm95_vm2, %v2830_v15  ;;  %2529 = vmatprep.subr.bf16.mxu0 %v2528_v19  ;;  %v338_v19 = vrot.slane %v2837_v41, %v2857_v11  ;;  %v473_v10 = vld [vmem:[#allocation3 + $0x250] sm:$0xff] }
  0x3c   :  { %413 = vmatprep.mubr.f32.mxu0 %v2742_v1  ;;  %2531 = vmatpush1.bf16.msra.mxu0 %v2530_v23  ;;  %v494_v43 = vld [vmem:[#allocation3 + $0x2f0] sm:$0xff]  ;;  %p2716_p5 = por %p2715_p4, %p2714_p3 }
  0x3d   :  { %2533 = vmatprep.subr.bf16.mxu0 %v2532_v24 }
  0x3e   :  { %p2717_p6 = pnand %p2716_p5, %p2710_p2 }
  0x40   :  { %2535 = vmatpush1.bf16.msra.mxu0 %v2534_v29 }
  0x41   :  { %2537 = vmatprep.subr.bf16.mxu0 %v2536_v30 }
  0x44   :  { %2539 = vmatpush1.bf16.msra.mxu0 %v2538_v35 }
  0x45   :  { %2541 = vmatprep.subr.bf16.mxu0 %v2540_v36  ;;  %v461_v36 = vld [vmem:[#allocation3 + $0x1b0] sm:$0xff] }
  0x48   :  { %2543 = vmatpush1.bf16.msra.mxu0 %v2542_v39  ;;  %v2545_v39 = vpack.c.bf16 %v462_v37, %v461_v36  ;;  %v492_v36 = vld [vmem:[#allocation3 + $0x2e0] sm:$0xff]  ;;  %v495_v37 = vld [vmem:[#allocation3 + $0x2f8] sm:$0xff] }
  0x49   :  { %2325 = vmatprep.subr.msk.mxu0 %vm99_vm1, %v94_v40  ;;  %v464_v40 = vld [vmem:[#allocation3 + $0x1e0] sm:$0xff] }
  0x4c   :  { %2326 = vmatpush1.msk.msra.mxu0 %vm99_vm1, %v2837_v41  ;;  %v2548_v41 = vpack.c.bf16 %v464_v40, %v463_v38  ;;  %v497_v38 = vld [vmem:[#allocation3 + $0x308] sm:$0xff] }
  0x4d   :  { %2327 = vmatmul.mubr.msk.f32.vlgmr.msra.gmra.mrb[2].mxu0 %vm95_vm2, %v2830_v15  ;;  %2457 = vmatprep.subr.mxu0 %v2742_v1 }
  0x4e   :  { %2459 = vmatprep.mubr.msk.f32.mxu0 %vm2743_vm0, %v2742_v1 }
 0x10e   :  { %v169_v51 = vpop.f32.mrb[0].mxu0 }
 0x10f   :  { %v2430_v55 = vpop.f32.mrb[1].mxu0  ;;  %2432 = vmatpush3.msra.mxu1 %v169_v51 }
 0x110   :  { %2434 = vmatmul.mubr.msk.f32.vlgmr.msra.gmra.mrb[0].mxu1 %vm173_vm3, %v2849_v49  ;;  %2513 = vmatprep.subr.bf16.mxu1 %v2512_v48  ;;  %v2554_v48 = vpack.c.bf16 %v468_v47, %v467_v46  ;;  %v499_v46 = vld [vmem:[#allocation3 + $0x318] sm:$0xff]  ;;  %v501_v47 = vld [vmem:[#allocation3 + $0x328] sm:$0xff] }
 0x111   :  { %2515 = vmatpush1.bf16.msra.mxu1 %v2514_v50  ;;  %328 = vmatprep.mubr.f32.mxu1 %v2742_v1 }
 0x112   :  { %2517 = vmatprep.subr.bf16.mxu1 %v2516_v52 }
 0x115   :  { %2519 = vmatpush1.bf16.msra.mxu1 %v2518_v58 }
 0x116   :  { %2521 = vmatprep.subr.bf16.mxu1 %v2520_v59 }
 0x119   :  { %2523 = vmatpush1.bf16.msra.mxu1 %v2522_v2 }
 0x11a   :  { %2525 = vmatprep.subr.bf16.mxu1 %v2524_v3 }
 0x11d   :  { %2527 = vmatpush1.bf16.msra.mxu1 %v2526_v6  ;;  %v472_v6 = vld [vmem:[#allocation3 + $0x248] sm:$0xff] }
 0x11e   :  { %2322 = vmatprep.subr.msk.mxu1 %vm99_vm1, %v75_v7  ;;  %v474_v7 = vld [vmem:[#allocation3 + $0x258] sm:$0xff] }
 0x11f   :  { %v2556_v9 = vpack.c.bf16 %v474_v7, %v472_v6 }
 0x120   :  { %v415_v13 = vpop.f32.mrb[2].mxu0 }
 0x121   :  { %2323 = vmatpush1.msk.msra.mxu1 %vm99_vm1, %v74_v8  ;;  %v417_v14 = vpop.f32.mrb[3].mxu0  ;;  %v416_v22 = vadd.f32 %v415_v13, %v338_v19  ;;  %v471_v8 = vld [vmem:[#allocation3 + $0x240] sm:$0xff]  ;;  %v478_v13 = vld [vmem:[#allocation3 + $0x278] sm:$0xff]  ;;  %v480_v19 = vld [vmem:[#allocation3 + $0x288] sm:$0xff] }
 0x122   :  { %2544 = vmatprep.subr.bf16.mxu1 %v2741_v0  ;;  %v418_v16 = vadd.f32 %v417_v14, %v342_v12  ;;  %v476_v12 = vld [vmem:[#allocation3 + $0x268] sm:$0xff]  ;;  %v2558_v14 = vpack.c.bf16 %v473_v10, %v471_v8 }
 0x124   :  { %435 = vrot.lane.b32.xlu0 %v418_v16, %s2744_s1 }
 0x196   :  { %v436_v29 = vpop.permute.xlu0 %435 }
 0x1e3   :  { %v243_v17 = vpop.f32.mrb[0].mxu1 }
 0x1e4   :  { %v2435_v18 = vpop.f32.mrb[1].mxu1  ;;  %2324 = vmatmul.mubr.msk.f32.vlgmr.msra.gmra.mrb[2].mxu1 %vm95_vm2, %v243_v17  ;;  %v475_v17 = vld [vmem:[#allocation3 + $0x260] sm:$0xff] }
 0x1e5   :  { %2454 = vmatprep.mubr.msk.f32.mxu1 %vm2743_vm0, %v2742_v1  ;;  %2546 = vmatpush3.bf16.msra.mxu1 %v2545_v39  ;;  %v477_v18 = vld [vmem:[#allocation3 + $0x270] sm:$0xff] }
 0x1e6   :  { %2547 = vmatprep.subr.bf16.mxu1 %v2741_v0 }
 0x1e9   :  { %2549 = vmatpush3.bf16.msra.mxu1 %v2548_v41 }
 0x1ea   :  { %2550 = vmatprep.subr.bf16.mxu1 %v2741_v0 }
 0x1ed   :  { %2552 = vmatpush3.bf16.msra.mxu1 %v2551_v45 }
 0x1ee   :  { %2553 = vmatprep.subr.bf16.mxu1 %v2741_v0 }
 0x1f1   :  { %2555 = vmatpush3.bf16.msra.mxu1 %v2554_v48  ;;  %v2578_v48 = vpack.c.bf16 %v496_v44, %v494_v43 }
 0x1f2   :  { %2452 = vmatprep.subr.mxu1 %v2742_v1 }
 0x1f5   :  { %2453 = vmatpush3.msk.msra.mxu1 %vm99_vm1, %v469_v54  ;;  %v505_v54 = vld [vmem:[#allocation3 + $0x348] sm:$0xff] }
 0x1f6   :  { %2557 = vmatprep.subr.bf16.mxu1 %v2556_v9 }
 0x2b7   :  { %v330_v21 = vpop.f32.mrb[2].mxu1 }
 0x2b8   :  { %v331_v23 = vadd.f32 %v330_v21, %v250_v20  ;;  %v332_v24 = vpop.f32.mrb[3].mxu1  ;;  %v482_v20 = vld [vmem:[#allocation3 + $0x298] sm:$0xff]  ;;  %v2562_v21 = vpack.c.bf16 %v477_v18, %v475_v17 }
 0x2b9   :  { %v333_v33 = vadd.f32 %v332_v24, %v254_v32  ;;  %v481_v24 = vld [vmem:[#allocation3 + $0x290] sm:$0xff]  ;;  %v2889_v32 = vld [vmem:[#allocation3 + $0x2c8] sm:$0x3] }
 0x2ba   :  { %v420_v25 = vadd.f32 %v416_v22, %v331_v23  ;;  %v2564_v22 = vpack.c.bf16 %v482_v20, %v480_v19  ;;  %v479_v23 = vld [vmem:[#allocation3 + $0x280] sm:$0xff] }
 0x2bb   :  { %v427_v50 = vadd.f32 %v418_v16, %v333_v33  ;;  %v2560_v16 = vpack.c.bf16 %v478_v13, %v476_v12 }
 0x2bc   :  { %v2328_v26 = vmul.f32 -1.442695, %v420_v25  ;;  %v484_v25 = vld [vmem:[#allocation3 + $0x2a8] sm:$0xff] }
 0x2bd   :  { %v2329_v51 = vmul.f32 -1.442695, %v427_v50  ;;  %v2580_v50 = vpack.c.bf16 %v501_v47, %v499_v46 }
 0x2be   :  { %2636 = vpow2.f32 %v2328_v26  ;;  %v486_v26 = vld [vmem:[#allocation3 + $0x2b8] sm:$0xff] }
 0x2c8   :  { %v2637_v27 = vpop.eup %2636 }
 0x2c9   :  { %v424_v28 = vadd.f32 1.0, %v2637_v27  ;;  %v2566_v27 = vpack.c.bf16 %v481_v24, %v479_v23 }
 0x2cb   :  { %2638 = vrcp.f32 %v424_v28  ;;  %v2568_v28 = vpack.c.bf16 %v486_v26, %v484_v25 }
 0x2d5   :  { %v2639_v30 = vpop.eup %2638 }
 0x2d6   :  { %v438_v31 = vmul.f32 %v2639_v30, %v436_v29  ;;  %v445_v57 = vsub.f32 1.0, %v2639_v30  ;;  %v483_v29 = vld [vmem:[#allocation3 + $0x2a0] sm:$0xff] }
 0x2d8   :  { %440 = vrot.lane.b32.xlu0 %v438_v31, %s2745_s16 }
 0x34a   :  { %v441_v34 = vpop.permute.xlu0 %440 }
 0x34b   :  { %v443_v35 = vadd.f32 %v441_v34, %v333_v33  ;;  %v491_v33 = vld [vmem:[#allocation3 + $0x2d8] sm:$0xff]  ;;  %v493_v34 = vld [vmem:[#allocation3 + $0x2e8] sm:$0xff] }
 0x34c   :  { %v2572_v39 = vpack.c.bf16 %v493_v34, %v491_v33 }
 0x34d   :  { %2640 = vtanh.f32 %v443_v35  ;;  %v490_v35 = vld [vmem:[#allocation3 + $0x2d0] sm:$0xff] }
 0x34e   :  { %2642 = vpow2.f32 %v2329_v51  ;;  %v2574_v40 = vpack.c.bf16 %v492_v36, %v490_v35  ;;  %v498_v51 = vld [vmem:[#allocation3 + $0x310] sm:$0xff] }
 0x357   :  { %v2641_v42 = vpop.eup %2640 }
 0x358   :  { %448 = vrot.lane.b32.xlu1 %v2641_v42, %s2746_s17  ;;  %v2643_v52 = vpop.eup %2642  ;;  %v2576_v42 = vpack.c.bf16 %v497_v38, %v495_v37 }
 0x359   :  { %v431_v53 = vadd.f32 1.0, %v2643_v52  ;;  %v500_v52 = vld [vmem:[#allocation3 + $0x320] sm:$0xff] }
 0x35b   :  { %2644 = vrcp.f32 %v431_v53  ;;  %v503_v53 = vld [vmem:[#allocation3 + $0x338] sm:$0xff] }
 0x35c   :  { %453 = vrot.lane.b32.xlu1 %v2830_v15, %s2747_s18 }
 0x365   :  { %v2645_v55 = vpop.eup %2644 }
 0x366   :  { %v446_v58 = vsub.f32 1.0, %v2645_v55 }
 0x3ca   :  { %v449_v56 = vpop.permute.xlu1 %448 }
 0x3cb   :  { %v451_v60 = vmul.f32 %v449_v56, %v445_v57  ;;  %v452_v61 = vmul.f32 %v449_v56, %v446_v58  ;;  %v2584_v56 = vpack.c.bf16 %v505_v54, %v503_v53  ;;  %v502_v57 = vld [vmem:[#allocation3 + $0x330] sm:$0xff]  ;;  %v504_v58 = vld [vmem:[#allocation3 + $0x340] sm:$0xff] }
 0x3ce   :  { %v454_v59 = vpop.permute.xlu1 %453 }
 0x3cf   :  { %v456_v0 = vmul.f32 %v2639_v30, %v454_v59  ;;  %v457_v62 = vmul.f32 %v2645_v55, %v454_v59  ;;  %v485_v30 = vld [vmem:[#allocation3 + $0x2b0] sm:$0xff]  ;;  %v2582_v55 = vpack.c.bf16 %v500_v52, %v498_v51  ;;  %v2586_v59 = vpack.c.bf16 %v504_v58, %v502_v57 }
 0x3d0   :  { %v2570_v31 = vpack.c.bf16 %v485_v30, %v483_v29 }
 0x3d1   :  { %v2876_v63 = vadd.f32 %v457_v62, %v452_v61  ;;  %v2878_v2 = vadd.f32 %v456_v0, %v451_v60  ;;  %v506_v60 = vld [vmem:[#allocation3 + $0x350] sm:$0x3]  ;;  %v487_v61 = vld [vmem:[#allocation3 + $0x2c0] sm:$0x3] }
 0x3d2   :  { %v664_v8 = vrot.slane %v487_v61, %v2857_v11 }
 0x3d3   :  { %512 = vrot.lane.b32.xlu1 %v2876_v63, %s2746_s17  ;;  %510 = vrot.lane.b32.xlu0 %v2878_v2, %s2746_s17 }
 0x445   :  { %v513_v3 = vpop.permute.xlu1 %512  ;;  %v511_v4 = vpop.permute.xlu0 %510 }
 0x446   :  { %v2884_v5 = vsel %vm514_vm4, %v511_v4, %v513_v3  ;;  %vm935_vm4 = vcmask 1006592  }
 0x447   :  { %2455 = vmatmul.mubr.msk.f32.vlgmr.msra.gmra.mrb[4].mxu1 %vm95_vm2, %v2884_v5 }
 0x448   :  { %742 = vmatprep.mubr.f32.mxu1 %v2742_v1  ;;  %2559 = vmatpush1.bf16.msra.mxu1 %v2558_v14 }
 0x449   :  { %2561 = vmatprep.subr.bf16.mxu1 %v2560_v16 }
 0x44c   :  { %2563 = vmatpush1.bf16.msra.mxu1 %v2562_v21 }
 0x44d   :  { %2565 = vmatprep.subr.bf16.mxu1 %v2564_v22  ;;  %v668_v22 = vrot.slane %v2889_v32, %v2857_v11 }
 0x450   :  { %2567 = vmatpush1.bf16.msra.mxu1 %v2566_v27 }
 0x451   :  { %2569 = vmatprep.subr.bf16.mxu1 %v2568_v28 }
 0x454   :  { %2571 = vmatpush1.bf16.msra.mxu1 %v2570_v31 }
 0x455   :  { %2333 = vmatprep.subr.msk.mxu1 %vm99_vm1, %v2889_v32 }
 0x458   :  { %2334 = vmatpush1.msk.msra.mxu1 %vm99_vm1, %v487_v61 }
 0x51a   :  { %v587_v41 = vpop.f32.mrb[4].mxu1 }
 0x51b   :  { %v2456_v45 = vpop.f32.mrb[5].mxu1  ;;  %2458 = vmatpush3.msra.mxu0 %v587_v41 }
 0x51c   :  { %2460 = vmatmul.mubr.msk.f32.vlgmr.msra.gmra.mrb[4].mxu0 %vm173_vm3, %v2849_v49  ;;  %2573 = vmatprep.subr.bf16.mxu0 %v2572_v39  ;;  %v507_v49 = vld [vmem:[#allocation3 + $0x358] sm:$0x3] }
 0x51d   :  { %2575 = vmatpush1.bf16.msra.mxu0 %v2574_v40  ;;  %827 = vmatprep.mubr.f32.mxu0 %v2742_v1  ;;  %v756_v3 = vrot.slane %v507_v49, %v2857_v11 }
 0x51e   :  { %2577 = vmatprep.subr.bf16.mxu0 %v2576_v42 }
 0x521   :  { %2579 = vmatpush1.bf16.msra.mxu0 %v2578_v48 }
 0x522   :  { %2581 = vmatprep.subr.bf16.mxu0 %v2580_v50 }
 0x525   :  { %2583 = vmatpush1.bf16.msra.mxu0 %v2582_v55  ;;  %v2922_v55 = vld [vmem:[#allocation6 + $0x60] sm:$0xff] }
 0x526   :  { %2585 = vmatprep.subr.bf16.mxu0 %v2584_v56  ;;  %v885_v56 = vld [vmem:[#allocation6 + $0x70] sm:$0x3]  ;;  %v945_v58 = vrot.slane %v2922_v55, 2 }
 0x529   :  { %2587 = vmatpush1.bf16.msra.mxu0 %v2586_v59  ;;  %v946_v59 = vrot.slane %v885_v56, 2 }
 0x52a   :  { %2336 = vmatprep.subr.msk.mxu0 %vm99_vm1, %v507_v49 }
 0x52d   :  { %2337 = vmatpush1.msk.msra.mxu0 %vm99_vm1, %v506_v60  ;;  %vm920_vm1 = vcmask 970224  }
 0x52e   :  { %2338 = vmatmul.mubr.msk.f32.vlgmr.msra.gmra.mrb[6].mxu0 %vm95_vm2, %v2884_v5  ;;  %2462 = vmatprep.subr.mxu0 %v2742_v1  ;;  %v752_v5 = vrot.slane %v506_v60, %v2857_v11 }
 0x52f   :  { %2464 = vmatprep.mubr.msk.f32.mxu0 %vm2743_vm0, %v2742_v1 }
 0x5ef   :  { %v657_v0 = vpop.f32.mrb[4].mxu0 }
 0x5f0   :  { %v2461_v62 = vpop.f32.mrb[5].mxu0  ;;  %2335 = vmatmul.mubr.msk.f32.vlgmr.msra.gmra.mrb[6].mxu1 %vm95_vm2, %v657_v0  ;;  %vm930_vm2 = vmor %vm929_vm14, %vm928_vm13  ;;  %v2756_v0 = vmov 12   ;;  %vm2027_vm13 = vcmask 498688   ;;  %vm2039_vm14 = vcmask 492544  }
 0x5f1   :  { %1036 = vmatprep.mubr.f32.mxu1 %v2742_v1  ;;  %2631 = vset.pattern.permute.xlu0 %v2756_v0 }
 0x5f2   :  { %2630 = vset.pattern.permute.xlu1 %v2756_v0 }
 0x601   :  { %v829_v4 = vpop.f32.mrb[6].mxu0 }
 0x602   :  { %v831_v6 = vpop.f32.mrb[7].mxu0  ;;  %v830_v10 = vadd.f32 %v829_v4, %v752_v5 }
 0x603   :  { %v832_v7 = vadd.f32 %v831_v6, %v756_v3 }
 0x605   :  { %849 = vrot.lane.b32.xlu0 %v832_v7, %s2744_s1 }
 0x677   :  { %v850_v20 = vpop.permute.xlu0 %849 }
 0x6c3   :  { %v744_v9 = vpop.f32.mrb[6].mxu1 }
 0x6c4   :  { %v745_v12 = vadd.f32 %v744_v9, %v664_v8  ;;  %v746_v13 = vpop.f32.mrb[7].mxu1 }
 0x6c5   :  { %v747_v23 = vadd.f32 %v746_v13, %v668_v22 }
 0x6c6   :  { %v834_v14 = vadd.f32 %v830_v10, %v745_v12 }
 0x6c7   :  { %v841_v27 = vadd.f32 %v832_v7, %v747_v23 }
 0x6c8   :  { %v2339_v16 = vmul.f32 -1.442695, %v834_v14 }
 0x6c9   :  { %v2340_v28 = vmul.f32 -1.442695, %v841_v27 }
 0x6ca   :  { %2646 = vpow2.f32 %v2339_v16 }
 0x6d4   :  { %v2647_v17 = vpop.eup %2646 }
 0x6d5   :  { %v838_v18 = vadd.f32 1.0, %v2647_v17 }
 0x6d7   :  { %2648 = vrcp.f32 %v838_v18 }
 0x6e1   :  { %v2649_v19 = vpop.eup %2648 }
 0x6e2   :  { %v852_v21 = vmul.f32 %v2649_v19, %v850_v20  ;;  %v859_v33 = vsub.f32 1.0, %v2649_v19  ;;  %v867_v35 = vmul.f32 %v2649_v19, %v2878_v2 }
 0x6e4   :  { %854 = vrot.lane.b32.xlu1 %v852_v21, %s2745_s16 }
 0x756   :  { %v855_v24 = vpop.permute.xlu1 %854 }
 0x757   :  { %v857_v25 = vadd.f32 %v855_v24, %v747_v23 }
 0x759   :  { %2650 = vtanh.f32 %v857_v25 }
 0x75a   :  { %2652 = vpow2.f32 %v2340_v28 }
 0x763   :  { %v2651_v26 = vpop.eup %2650 }
 0x764   :  { %862 = vrot.lane.b32.xlu0 %v2651_v26, %s2746_s17  ;;  %v2653_v29 = vpop.eup %2652 }
 0x765   :  { %v845_v30 = vadd.f32 1.0, %v2653_v29 }
 0x767   :  { %2654 = vrcp.f32 %v845_v30 }
 0x771   :  { %v2655_v31 = vpop.eup %2654 }
 0x772   :  { %v860_v34 = vsub.f32 1.0, %v2655_v31  ;;  %v868_v11 = vmul.f32 %v2655_v31, %v2876_v63  ;;  %v916_v63 = vcombine.high %v2830_v15, %v2830_v15 }
 0x7d6   :  { %v863_v36 = vpop.permute.xlu0 %862 }
 0x7d7   :  { %v865_v32 = vmul.f32 %v863_v36, %v859_v33  ;;  %v866_v37 = vmul.f32 %v863_v36, %v860_v34 }
 0x7d9   :  { %v869_v38 = vadd.f32 %v867_v35, %v865_v32  ;;  %v870_v39 = vadd.f32 %v868_v11, %v866_v37  ;;  %v2983_v32 = vld [vmem:[#allocation6] sm:$0xff]  ;;  %v2985_v37 = vld [vmem:[#allocation6 + $0x10] sm:$0xff] }
 0x7db   :  { %v905_v40 = vcombine.high %v869_v38, %v870_v39  ;;  %v891_v41 = vcombine.low %v869_v38, %v870_v39  ;;  %v2758_v38 = vmov 8   ;;  %v2989_v39 = vld [vmem:[#allocation6 + $0x20] sm:$0xff] }
 0x7dd   :  { %906 = vrot.lane.b32.xlu0 %v905_v40, %s2748_s19  ;;  %892 = vrot.lane.b32.xlu1 %v891_v41, %s2749_s20 }
 0x7e1   :  { %922 = vrot.lane.b32.xlu0 %v891_v41, %s2750_s21  ;;  %900 = vrot.lane.b32.xlu1 %v2830_v15, %s2751_s22  ;;  %v2995_v41 = vld [vmem:[#allocation6 + $0x40] sm:$0xff] }
 0x7e5   :  { %932 = vrot.lane.b32.xlu0 %v905_v40, %s2752_s23  ;;  %917 = vrot.lane.b32.xlu1 %v916_v63, %s2753_s24  ;;  %v2991_v40 = vld [vmem:[#allocation6 + $0x30] sm:$0xff] }
 0x7e6   :  { %v2997_v63 = vld [vmem:[#allocation6 + $0x50] sm:$0xff] }
 0x84f   :  { %v907_v2 = vpop.permute.xlu0 %906  ;;  %v893_v42 = vpop.permute.xlu1 %892 }
 0x850   :  { %v908_v43 = vrot.slane %v907_v2, 4  ;;  %v894_v44 = vrot.slane %v893_v42, 4 }
 0x852   :  { %v896_v45 = vsel %vm895_vm6, %v893_v42, %v894_v44  ;;  %v910_v15 = vsel %vm909_vm10, %v908_v43, %v907_v2  ;;  %vm944_vm6 = vcmask 1045504   ;;  %v3004_v2 = vld [vmem:[#allocation6 + $0x8] sm:$0xff]  ;;  %v874_v43 = vld [vmem:[#allocation6 + $0x18] sm:$0xff] }
 0x853   :  { %v923_v46 = vpop.permute.xlu0 %922  ;;  %899 = vst.msk [vmem:[#allocation2] sm:$0xf] %vm898_vm9, %v896_v45  ;;  %v901_v47 = vpop.permute.xlu1 %900  ;;  %v947_v61 = vsel %vm944_vm6, %v945_v58, %v946_v59  ;;  %vm962_vm9 = vcmask 31744   ;;  %3547 = vst [vmem:[#allocation12_spill] sm:$0xff] %v3004_v2  ;;  %v876_v42 = vld [vmem:[#allocation6 + $0x28] sm:$0xff]  ;;  %v878_v44 = vld [vmem:[#allocation6 + $0x38] sm:$0xff] }
 0x854   :  { %v924_v48 = vrot.slane %v923_v46, 4  ;;  %904 = vst.msk [vmem:[#allocation2] sm:$0xf] %vm903_vm11, %v901_v47  ;;  %vm1270_vm11 = vcmask 1031168   ;;  %v880_v45 = vld [vmem:[#allocation6 + $0x48] sm:$0xff] }
 0x855   :  { %915 = vst.msk [vmem:[#allocation2] sm:$0xff] %vm914_vm12, %v910_v15  ;;  %v884_v47 = vld [vmem:[#allocation6 + $0x68] sm:$0xff]  ;;  %vm1874_vm12 = vcmask 965632  }
 0x856   :  { %v926_v52 = vsel %vm925_vm15, %v924_v48, %v923_v46  ;;  %v882_v46 = vld [vmem:[#allocation6 + $0x58] sm:$0xff]  ;;  %vm2301_vm15 = vcmask 8200  }
 0x857   :  { %v933_v50 = vpop.permute.xlu0 %932  ;;  %v918_v51 = vpop.permute.xlu1 %917 }
 0x858   :  { %v934_v53 = vrot.slane %v933_v50, 4  ;;  %921 = vst.msk [vmem:[#allocation2 + $0x4] sm:$0xf] %vm920_vm1, %v918_v51 }
 0x859   :  { %931 = vst.msk [vmem:[#allocation2 + $0x4] sm:$0xff] %vm930_vm2, %v926_v52 }
 0x85a   :  { %v936_v54 = vsel %vm935_vm4, %v933_v50, %v934_v53 }
 0x85b   :  { %939 = vst.msk [vmem:[#allocation2 + $0x8] sm:$0xf] %vm938_vm5, %v936_v54 }
 0x860   :  { %v940_v57 = vld [vmem:[#allocation2] sm:$0xff] }
 0x861   :  { %v952_v49 = vcombine.high %v940_v57, %v940_v57 }
 0x862   :  { %v941_v60 = vld [vmem:[#allocation2 + $0x8] sm:$0xf] }
 0x863   :  { %955 = vrot.lane.b32.xlu1 %v952_v49, %s2754_s25  ;;  %957 = vrot.lane.b32.xlu0 %v941_v60, %s2754_s25 }
 0x867   :  { %953 = vrot.lane.b32.xlu1 %v940_v57, %s2754_s25  ;;  %948 = vrot.lane.b32.xlu0 %v947_v61, %s2755_s26 }
 0x86b   :  { %1266 = vrot.lane.b32.xlu1 %v952_v49, %s2744_s1  ;;  %1268 = vrot.lane.b32.xlu0 %v941_v60, %s2744_s1 }
 0x86f   :  { %1264 = vrot.lane.b32.xlu1 %v940_v57, %s2744_s1  ;;  %1262 = vrot.lane.b32.xlu0 %v947_v61, %s2757_s27 }
 0x873   :  { %1426 = vperm.xlu1 %2630, %v2922_v55   ;;  %1429 = vperm.xlu0 %2631, %v885_v56  }
 0x877   :  { %2633 = vset.pattern.permute.xlu1 %v2758_v38  ;;  %2632 = vset.pattern.permute.xlu0 %v2758_v38 }
 0x8d5   :  { %v956_v62 = vpop.permute.xlu1 %955  ;;  %v958_v3 = vpop.permute.xlu0 %957 }
 0x8d6   :  { %2463 = vmatpush3.msk.msra.mxu0 %vm965_vm7, %v958_v3  ;;  %v961_v4 = vsel %vm959_vm8, %v956_v62, %v958_v3 }
 0x8d7   :  { %2341 = vmatprep.subr.msk.mxu1 %vm965_vm7, %v961_v4  ;;  %2467 = vmatprep.subr.mxu0 %v2742_v1 }
 0x8d9   :  { %v954_v6 = vpop.permute.xlu1 %953  ;;  %v949_v7 = vpop.permute.xlu0 %948 }
 0x8da   :  { %v960_v5 = vsel %vm959_vm8, %v954_v6, %v956_v62  ;;  %2465 = vmatmul.mubr.msk.f32.vlgmr.msra.gmra.mrb[8].mxu0 %vm962_vm9, %v949_v7 }
 0x8db   :  { %2468 = vmatpush3.msk.msra.mxu0 %vm965_vm7, %v941_v60  ;;  %2342 = vmatpush1.msk.msra.mxu1 %vm965_vm7, %v960_v5 }
 0x8dc   :  { %2343 = vmatmul.mubr.msk.f32.vlgmr.msra.gmra.mrb[8].mxu1 %vm962_vm9, %v949_v7  ;;  %2346 = vmatprep.subr.msk.mxu1 %vm965_vm7, %v952_v49 }
 0x8dd   :  { %v1267_v8 = vpop.permute.xlu1 %1266  ;;  %2347 = vmatpush1.msk.msra.mxu1 %vm965_vm7, %v940_v57  ;;  %2469 = vmatprep.mubr.msk.f32.mxu0 %vm2743_vm0, %v2742_v1  ;;  %v1269_v9 = vpop.permute.xlu0 %1268 }
 0x8de   :  { %2472 = vmatprep.subr.mxu0 %v2742_v1  ;;  %2470 = vmatmul.mubr.msk.f32.vlgmr.msra.gmra.mrb[10].mxu0 %vm962_vm9, %v947_v61  ;;  %v1272_v10 = vsel %vm1270_vm11, %v1267_v8, %v1269_v9 }
 0x8df   :  { %2473 = vmatpush3.msk.msra.mxu0 %vm965_vm7, %v1269_v9  ;;  %2351 = vmatprep.subr.msk.mxu1 %vm965_vm7, %v1272_v10 }
 0x8e0   :  { %2474 = vmatprep.mubr.msk.f32.mxu0 %vm2743_vm0, %v2742_v1  ;;  %1185 = vmatprep.mubr.f32.mxu1 %v2742_v1 }
 0x8e1   :  { %v1265_v12 = vpop.permute.xlu1 %1264  ;;  %v1263_v13 = vpop.permute.xlu0 %1262  ;;  %2477 = vmatprep.subr.mxu0 %v2742_v1 }
 0x8e2   :  { %v1271_v14 = vsel %vm1270_vm11, %v1265_v12, %v1267_v8  ;;  %2475 = vmatmul.mubr.msk.f32.vlgmr.msra.gmra.mrb[12].mxu0 %vm962_vm9, %v1263_v13 }
 0x8e3   :  { %2479 = vmatprep.mubr.msk.f32.mxu0 %vm2743_vm0, %v2742_v1 }
 0x8e4   :  { %2348 = vmatmul.mubr.msk.f32.vlgmr.msra.gmra.mrb[8].mxu1 %vm962_vm9, %v947_v61 }
 0x8e5   :  { %2352 = vmatpush1.msk.msra.mxu1 %vm965_vm7, %v1271_v14  ;;  %1345 = vmatprep.mubr.f32.mxu1 %v2742_v1 }
 0x8ec   :  { %2353 = vmatmul.mubr.msk.f32.vlgmr.msra.gmra.mrb[8].mxu1 %vm962_vm9, %v1263_v13 }
 0x8ed   :  { %1584 = vmatprep.mubr.f32.mxu1 %v2742_v1 }
 0x8f2   :  { %v1427_v17 = vpop.permute.xlu1 %1426  ;;  %v1430_v19 = vpop.permute.xlu0 %1429 }
 0x8f3   :  { %v1431_v21 = vrot.slane %v1427_v17, 2  ;;  %v1432_v22 = vrot.slane %v1430_v19, 2 }
 0x8f5   :  { %v1433_v26 = vsel %vm944_vm6, %v1431_v21, %v1432_v22 }
 0x9ad   :  { %v1109_v16 = vpop.f32.mrb[8].mxu0 }
 0x9ae   :  { %v2466_v18 = vpop.f32.mrb[9].mxu0 }
 0x9b1   :  { %v1258_v20 = vpop.f32.mrb[10].mxu0 }
 0x9b2   :  { %v1259_v23 = vadd.f32 %v1258_v20, %v1109_v16  ;;  %v2471_v24 = vpop.f32.mrb[11].mxu0 }
 0x9b5   :  { %v1418_v25 = vpop.f32.mrb[12].mxu0 }
 0x9b6   :  { %v1424_v27 = vadd.f32 %v1418_v25, %v1259_v23  ;;  %v2476_v28 = vpop.f32.mrb[13].mxu0 }
 0x9b8   :  { %v1437_v29 = vadd.f32 %v1433_v26, %v1424_v27 }
 0x9ba   :  { %v2965_v30 = vmax.f32 %v1437_v29, 0.0 }
 0x9bc   :  { %1448 = vrot.lane.b32.xlu1 %v2965_v30, %s2754_s25 }
 0x9bf   :  { %v1347_v31 = vpop.f32.mrb[8].mxu1 }
 0x9c0   :  { %v1435_v33 = vadd.f32 %v1433_v26, %v1347_v31  ;;  %v1349_v34 = vpop.f32.mrb[9].mxu1 }
 0x9c1   :  { %v1436_v35 = vadd.f32 %v1433_v26, %v1349_v34 }
 0x9c2   :  { %v2969_v36 = vmax.f32 %v1435_v33, 0.0 }
 0x9c3   :  { %v2971_v11 = vmax.f32 %v1436_v35, 0.0 }
 0x9c4   :  { %1444 = vrot.lane.b32.xlu0 %v2969_v36, %s2754_s25 }
 0x9c5   :  { %1446 = vrot.lane.b32.xlu1 %v2971_v11, %s2754_s25 }
 0x9c8   :  { %1462 = vrot.lane.b32.xlu0 %v2965_v30, %s2744_s1 }
 0x9c9   :  { %1460 = vrot.lane.b32.xlu1 %v2971_v11, %s2744_s1 }
 0x9cc   :  { %1474 = vperm.xlu0 %2632, %v2983_v32  }
 0x9cd   :  { %1458 = vrot.lane.b32.xlu1 %v2969_v36, %s2744_s1 }
 0x9d0   :  { %1489 = vperm.xlu0 %2632, %v2991_v40  }
 0x9d1   :  { %1479 = vperm.xlu1 %2633, %v2985_v37  }
 0x9d4   :  { %1499 = vperm.xlu0 %2632, %v2997_v63  }
 0x9d5   :  { %1484 = vperm.xlu1 %2633, %v2989_v39  }
 0x9d8   :  { %1907 = vrot.lane.b32.xlu0 %v2983_v32, %s2759_s28 }
 0x9d9   :  { %1494 = vperm.xlu1 %2633, %v2995_v41  }
 0x9dc   :  { %1911 = vrot.lane.b32.xlu0 %v2985_v37, %s2759_s28 }
 0x9dd   :  { %1503 = vperm.xlu1 %2633, %v2922_v55  }
 0x9e0   :  { %1917 = vrot.lane.b32.xlu0 %v876_v42, %s2759_s28 }
 0x9e1   :  { %1909 = vrot.lane.b32.xlu1 %v3004_v2, %s2759_s28 }
 0x9e4   :  { %2072 = vrot.lane.b32.xlu0 %v2985_v37, %s2760_s29 }
 0x9e5   :  { %1913 = vrot.lane.b32.xlu1 %v874_v43, %s2759_s28 }
 0x9e8   :  { %2187 = vrot.lane.b32.xlu0 %v3004_v2, %s2748_s19 }
 0x9e9   :  { %1915 = vrot.lane.b32.xlu1 %v2989_v39, %s2759_s28 }
 0x9ec   :  { %2191 = vrot.lane.b32.xlu0 %v874_v43, %s2748_s19 }
 0x9ed   :  { %2070 = vrot.lane.b32.xlu1 %v2983_v32, %s2760_s29 }
 0x9f0   :  { %1919 = vrot.lane.b32.xlu0 %v2991_v40, %s2759_s28 }
 0x9f1   :  { %2185 = vrot.lane.b32.xlu1 %v2983_v32, %s2748_s19 }
 0x9f4   :  { %2074 = vrot.lane.b32.xlu0 %v2989_v39, %s2760_s29 }
 0x9f5   :  { %2189 = vrot.lane.b32.xlu1 %v2985_v37, %s2748_s19 }
 0x9f8   :  { %2195 = vrot.lane.b32.xlu0 %v876_v42, %s2748_s19 }
 0x9f9   :  { %1921 = vrot.lane.b32.xlu1 %v878_v44, %s2759_s28 }
 0x9fc   :  { %1923 = vrot.lane.b32.xlu0 %v2995_v41, %s2759_s28 }
 0x9fd   :  { %2193 = vrot.lane.b32.xlu1 %v2989_v39, %s2748_s19 }
 0xa00   :  { %2076 = vrot.lane.b32.xlu0 %v2991_v40, %s2760_s29 }
 0xa01   :  { %1925 = vrot.lane.b32.xlu1 %v880_v45, %s2759_s28 }
 0xa04   :  { %2199 = vrot.lane.b32.xlu0 %v878_v44, %s2748_s19 }
 0xa05   :  { %2197 = vrot.lane.b32.xlu1 %v2991_v40, %s2748_s19 }
 0xa08   :  { %1927 = vrot.lane.b32.xlu0 %v2997_v63, %s2759_s28 }
 0xa09   :  { %1929 = vrot.lane.b32.xlu1 %v882_v46, %s2759_s28 }
 0xa0c   :  { %2078 = vrot.lane.b32.xlu0 %v2995_v41, %s2760_s29 }
 0xa0d   :  { %2201 = vrot.lane.b32.xlu1 %v2995_v41, %s2748_s19 }
 0xa10   :  { %2203 = vrot.lane.b32.xlu0 %v880_v45, %s2748_s19 }
 0xa11   :  { %1933 = vrot.lane.b32.xlu1 %v884_v47, %s2759_s28 }
 0xa14   :  { %1931 = vrot.lane.b32.xlu0 %v2922_v55, %s2759_s28 }
 0xa15   :  { %2205 = vrot.lane.b32.xlu1 %v2997_v63, %s2748_s19 }
 0xa18   :  { %2080 = vrot.lane.b32.xlu0 %v2997_v63, %s2760_s29 }
 0xa19   :  { %2082 = vrot.lane.b32.xlu1 %v2922_v55, %s2760_s29 }
 0xa1c   :  { %2207 = vrot.lane.b32.xlu0 %v882_v46, %s2748_s19 }
 0xa1d   :  { %2211 = vrot.lane.b32.xlu1 %v884_v47, %s2748_s19 }
 0xa20   :  { %2209 = vrot.lane.b32.xlu0 %v2922_v55, %s2748_s19 }
 0xa21   :  { %1848 = vrot.lane.b32.xlu1 %v2985_v37, %s2761_s30 }
 0xa24   :  { %1846 = vrot.lane.b32.xlu0 %v2983_v32, %s2761_s30 }
 0xa25   :  { %1852 = vrot.lane.b32.xlu1 %v2991_v40, %s2761_s30 }
 0xa28   :  { %1850 = vrot.lane.b32.xlu0 %v2989_v39, %s2761_s30 }
 0xa29   :  { %1854 = vrot.lane.b32.xlu1 %v2995_v41, %s2761_s30 }
 0xa2d   :  { %1856 = vrot.lane.b32.xlu1 %v2997_v63, %s2761_s30 }
 0xa2e   :  { %v1449_v15 = vpop.permute.xlu1 %1448 }
 0xa2f   :  { %v1457_v52 = vmax.f32 %v2965_v30, %v1449_v15 }
 0xa31   :  { %1858 = vrot.lane.b32.xlu1 %v2922_v55, %s2761_s30 }
 0xa36   :  { %v1445_v48 = vpop.permute.xlu0 %1444 }
 0xa37   :  { %v1447_v50 = vpop.permute.xlu1 %1446 }
 0xa38   :  { %v1451_v51 = vsel %vm959_vm8, %v1447_v50, %v1449_v15  ;;  %v1450_v58 = vsel %vm959_vm8, %v1445_v48, %v1447_v50 }
 0xa39   :  { %v1456_v54 = vmax.f32 %v2971_v11, %v1451_v51  ;;  %v1455_v60 = vmax.f32 %v2969_v36, %v1450_v58 }
 0xa3a   :  { %v1463_v53 = vpop.permute.xlu0 %1462 }
 0xa3b   :  { %v1471_v56 = vmax.f32 %v1457_v52, %v1463_v53  ;;  %v1461_v57 = vpop.permute.xlu1 %1460 }
 0xa3c   :  { %v1465_v59 = vsel %vm1270_vm11, %v1461_v57, %v1463_v53 }
 0xa3d   :  { %2478 = vmatpush3.msra.mxu0 %v1471_v56  ;;  %v1470_v49 = vmax.f32 %v1456_v54, %v1465_v59 }
 0xa3e   :  { %2480 = vmatmul.mubr.msk.f32.vlgmr.msra.gmra.mrb[14].mxu0 %vm173_vm3, %v2983_v32 }
 0xa3f   :  { %v1459_v61 = vpop.permute.xlu1 %1458  ;;  %1520 = vmatprep.subr.mxu1 %v1470_v49  ;;  %2482 = vmatprep.mubr.msk.f32.mxu0 %vm2743_vm0, %v2742_v1 }
 0xa40   :  { %v1464_v0 = vsel %vm1270_vm11, %v1459_v61, %v1461_v57 }
 0xa41   :  { %v1469_v62 = vmax.f32 %v1455_v60, %v1464_v0 }
 0xa42   :  { %2483 = vmatmul.mubr.msk.f32.gmra.mrb[16].mxu0 %vm173_vm3, %v2985_v37 }
 0xa43   :  { %1521 = vmatpush1.msra.mxu1 %v1469_v62  ;;  %2485 = vmatprep.mubr.msk.f32.mxu0 %vm2743_vm0, %v2742_v1 }
 0xa44   :  { %2356 = vmatmul.mubr.msk.f32.vlgmr.msra.gmra.mrb[10].mxu1 %vm173_vm3, %v2983_v32 }
 0xa45   :  { %1590 = vmatprep.mubr.f32.mxu1 %v2742_v1 }
 0xa46   :  { %2486 = vmatmul.mubr.msk.f32.gmra.mrb[18].mxu0 %vm173_vm3, %v2989_v39 }
 0xa47   :  { %2488 = vmatprep.mubr.msk.f32.mxu0 %vm2743_vm0, %v2742_v1 }
 0xa48   :  { %2357 = vmatmul.mubr.msk.f32.gmra.mrb[12].mxu1 %vm173_vm3, %v2985_v37 }
 0xa49   :  { %1596 = vmatprep.mubr.f32.mxu1 %v2742_v1 }
 0xa4a   :  { %2489 = vmatmul.mubr.msk.f32.gmra.mrb[20].mxu0 %vm173_vm3, %v2991_v40 }
 0xa4b   :  { %2491 = vmatprep.mubr.msk.f32.mxu0 %vm2743_vm0, %v2742_v1  ;;  %v3122_v3 = vpop.permute.xlu0 %1474 }
 0xa4c   :  { %2358 = vmatmul.mubr.msk.f32.gmra.mrb[14].mxu1 %vm173_vm3, %v2989_v39 }
 0xa4d   :  { %1602 = vmatprep.mubr.f32.mxu1 %v2742_v1 }
 0xa4e   :  { %2492 = vmatmul.mubr.msk.f32.gmra.mrb[22].mxu0 %vm173_vm3, %v2995_v41 }
 0xa4f   :  { %2494 = vmatprep.mubr.msk.f32.mxu0 %vm2743_vm0, %v2742_v1  ;;  %v3124_v4 = vpop.permute.xlu0 %1489 }
 0xa50   :  { %2359 = vmatmul.mubr.msk.f32.gmra.mrb[16].mxu1 %vm173_vm3, %v2991_v40  ;;  %v3126_v6 = vpop.permute.xlu1 %1479 }
 0xa51   :  { %1608 = vmatprep.mubr.f32.mxu1 %v2742_v1 }
 0xa52   :  { %2495 = vmatmul.mubr.msk.f32.gmra.mrb[24].mxu0 %vm173_vm3, %v2997_v63 }
 0xa53   :  { %2497 = vmatprep.mubr.msk.f32.mxu0 %vm2743_vm0, %v2742_v1  ;;  %v3128_v7 = vpop.permute.xlu0 %1499  ;;  %vm1935_vm0 = vcmask 990208  }
 0xa54   :  { %2360 = vmatmul.mubr.msk.f32.gmra.mrb[18].mxu1 %vm173_vm3, %v2995_v41  ;;  %v3130_v5 = vpop.permute.xlu1 %1484 }
 0xa55   :  { %1614 = vmatprep.mubr.f32.mxu1 %v2742_v1 }
 0xa56   :  { %2498 = vmatmul.mubr.msk.f32.gmra.mrb[26].mxu0 %vm173_vm3, %v2922_v55 }
 0xa57   :  { %v3132_v8 = vpop.permute.xlu0 %1907 }
 0xa58   :  { %2361 = vmatmul.mubr.msk.f32.gmra.mrb[20].mxu1 %vm173_vm3, %v2997_v63  ;;  %v3134_v9 = vpop.permute.xlu1 %1494 }
 0xa59   :  { %1620 = vmatprep.mubr.f32.mxu1 %v2742_v1 }
 0xa5b   :  { %v3136_v10 = vpop.permute.xlu0 %1911 }
 0xa5c   :  { %2362 = vmatmul.mubr.msk.f32.gmra.mrb[22].mxu1 %vm173_vm3, %v2922_v55  ;;  %v3140_v12 = vpop.permute.xlu1 %1503 }
 0xa5f   :  { %v3138_v1 = vpop.permute.xlu0 %1917 }
 0xa60   :  { %v3144_v13 = vpop.permute.xlu1 %1909 }
 0xa63   :  { %v3142_v55 = vpop.permute.xlu0 %2072 }
 0xa64   :  { %v3146_v16 = vpop.permute.xlu1 %1913 }
 0xa67   :  { %v2188_v14 = vpop.permute.xlu0 %2187 }
 0xa68   :  { %v3150_v18 = vpop.permute.xlu1 %1915 }
 0xa6b   :  { %v3148_v17 = vpop.permute.xlu0 %2191 }
 0xa6c   :  { %v3154_v20 = vpop.permute.xlu1 %2070 }
 0xa6f   :  { %v3152_v19 = vpop.permute.xlu0 %1919 }
 0xa70   :  { %v2186_v22 = vpop.permute.xlu1 %2185 }
 0xa71   :  { %v3159_v23 = vsel %vm909_vm10, %v2186_v22, %v2188_v14 }
 0xa73   :  { %v3156_v21 = vpop.permute.xlu0 %2074 }
 0xa74   :  { %v3163_v25 = vpop.permute.xlu1 %2189 }
 0xa77   :  { %v3161_v24 = vpop.permute.xlu0 %2195 }
 0xa78   :  { %v3167_v27 = vpop.permute.xlu1 %1921 }
 0xa7b   :  { %v3165_v26 = vpop.permute.xlu0 %1923 }
 0xa7c   :  { %3548 = vst [vmem:[#allocation13_spill] sm:$0xff] %v3165_v26  ;;  %v3171_v29 = vpop.permute.xlu1 %2193 }
 0xa7f   :  { %v3169_v28 = vpop.permute.xlu0 %2076 }
 0xa80   :  { %v3175_v31 = vpop.permute.xlu1 %1925 }
 0xa83   :  { %v3173_v30 = vpop.permute.xlu0 %2199 }
 0xa84   :  { %v3179_v34 = vpop.permute.xlu1 %2197 }
 0xa87   :  { %v3177_v33 = vpop.permute.xlu0 %1927 }
 0xa88   :  { %3549 = vst [vmem:[#allocation14_spill] sm:$0xff] %v3177_v33  ;;  %v3183_v36 = vpop.permute.xlu1 %1929  ;;  %v2214_v33 = vsel %vm909_vm10, %v3163_v25, %v3148_v17  ;;  %v2215_v17 = vsel %vm909_vm10, %v3171_v29, %v3161_v24 }
 0xa8b   :  { %v3181_v35 = vpop.permute.xlu0 %2078 }
 0xa8c   :  { %3550 = vst [vmem:[#allocation15_spill] sm:$0xff] %v3181_v35  ;;  %v3187_v32 = vpop.permute.xlu1 %2201 }
 0xa8f   :  { %v3185_v11 = vpop.permute.xlu0 %2203 }
 0xa90   :  { %v3191_v38 = vpop.permute.xlu1 %1933 }
 0xa93   :  { %v3189_v37 = vpop.permute.xlu0 %1931 }
 0xa94   :  { %3551 = vst [vmem:[#allocation16_spill] sm:$0xff] %v3189_v37  ;;  %v3195_v40 = vpop.permute.xlu1 %2205 }
 0xa97   :  { %v3193_v39 = vpop.permute.xlu0 %2080 }
 0xa98   :  { %3552 = vst [vmem:[#allocation17_spill] sm:$0xff] %v3193_v39  ;;  %v3199_v63 = vpop.permute.xlu1 %2082 }
 0xa99   :  { %3553 = vst [vmem:[#allocation18_spill] sm:$0xff] %v3199_v63 }
 0xa9b   :  { %v3197_v41 = vpop.permute.xlu0 %2207 }
 0xa9c   :  { %v2212_v43 = vpop.permute.xlu1 %2211 }
 0xa9f   :  { %v2210_v42 = vpop.permute.xlu0 %2209 }
 0xaa0   :  { %v3202_v44 = vsel %vm909_vm10, %v2210_v42, %v2212_v43 }
 0xaa1   :  { %3554 = vst [vmem:[#allocation19_spill] sm:$0xff] %v3202_v44 }
 0xb11   :  { %v1693_v45 = vpop.f32.mrb[14].mxu0 }
 0xb12   :  { %v3205_v46 = vadd.f32 %v1693_v45, %v3122_v3  ;;  %v2481_v47 = vpop.f32.mrb[15].mxu0 }
 0xb14   :  { %1752 = vrot.lane.b32.xlu1 %v3205_v46, %s2744_s1 }
 0xb15   :  { %v1698_v15 = vpop.f32.mrb[16].mxu0 }
 0xb16   :  { %v3210_v48 = vadd.f32 %v1698_v15, %v3126_v6  ;;  %v2484_v50 = vpop.f32.mrb[17].mxu0 }
 0xb17   :  { %v1586_v51 = vpop.f32.mrb[10].mxu1 }
 0xb18   :  { %v3213_v52 = vadd.f32 %v1586_v51, %v3122_v3  ;;  %v1588_v53 = vpop.f32.mrb[11].mxu1  ;;  %1758 = vrot.lane.b32.xlu1 %v3210_v48, %s2744_s1 }
 0xb19   :  { %v1703_v54 = vpop.f32.mrb[18].mxu0  ;;  %v3235_v42 = vadd.f32 %v1588_v53, %v3122_v3 }
 0xb1a   :  { %v3218_v56 = vadd.f32 %v1703_v54, %v3130_v5  ;;  %1748 = vrot.lane.b32.xlu0 %v3213_v52, %s2744_s1  ;;  %v2487_v57 = vpop.f32.mrb[19].mxu0 }
 0xb1b   :  { %v1592_v58 = vpop.f32.mrb[12].mxu1 }
 0xb1c   :  { %v1594_v59 = vpop.f32.mrb[13].mxu1  ;;  %1764 = vrot.lane.b32.xlu1 %v3218_v56, %s2744_s1  ;;  %v3225_v60 = vadd.f32 %v1592_v58, %v3126_v6 }
 0xb1d   :  { %v1708_v49 = vpop.f32.mrb[20].mxu0  ;;  %v3245_v51 = vadd.f32 %v1594_v59, %v3126_v6 }
 0xb1e   :  { %v3228_v61 = vadd.f32 %v1708_v49, %v3124_v4  ;;  %v2490_v0 = vpop.f32.mrb[21].mxu0 }
 0xb1f   :  { %v1598_v62 = vpop.f32.mrb[14].mxu1 }
 0xb20   :  { %v1600_v14 = vpop.f32.mrb[15].mxu1  ;;  %1754 = vrot.lane.b32.xlu1 %v3225_v60, %s2744_s1  ;;  %1770 = vrot.lane.b32.xlu0 %v3228_v61, %s2744_s1  ;;  %v3255_v49 = vadd.f32 %v1598_v62, %v3130_v5 }
 0xb21   :  { %v1713_v22 = vpop.f32.mrb[22].mxu0 }
 0xb22   :  { %v3238_v43 = vadd.f32 %v1713_v22, %v3134_v9  ;;  %v2493_v45 = vpop.f32.mrb[23].mxu0 }
 0xb23   :  { %v1604_v47 = vpop.f32.mrb[16].mxu1  ;;  %v3265_v45 = vadd.f32 %v1600_v14, %v3130_v5 }
 0xb24   :  { %v1606_v15 = vpop.f32.mrb[17].mxu1  ;;  %1776 = vrot.lane.b32.xlu1 %v3238_v43, %s2744_s1  ;;  %1750 = vrot.lane.b32.xlu0 %v3235_v42, %s2744_s1  ;;  %v3258_v0 = vadd.f32 %v1604_v47, %v3124_v4 }
 0xb25   :  { %v1718_v50 = vpop.f32.mrb[24].mxu0  ;;  %v3275_v47 = vadd.f32 %v1606_v15, %v3124_v4 }
 0xb26   :  { %v3248_v54 = vadd.f32 %v1718_v50, %v3128_v7  ;;  %v2496_v3 = vpop.f32.mrb[25].mxu0 }
 0xb27   :  { %v1610_v53 = vpop.f32.mrb[18].mxu1 }
 0xb28   :  { %v1612_v57 = vpop.f32.mrb[19].mxu1  ;;  %1756 = vrot.lane.b32.xlu0 %v3245_v51, %s2744_s1  ;;  %1782 = vrot.lane.b32.xlu1 %v3248_v54, %s2744_s1  ;;  %v3285_v5 = vadd.f32 %v1610_v53, %v3134_v9  ;;  %v1849_v53 = vpop.permute.xlu1 %1848 }
 0xb29   :  { %v1723_v58 = vpop.f32.mrb[26].mxu0 }
 0xb2a   :  { %v2499_v6 = vpop.f32.mrb[27].mxu0  ;;  %v3268_v50 = vadd.f32 %v1723_v58, %v3140_v12 }
 0xb2b   :  { %v1616_v59 = vpop.f32.mrb[20].mxu1  ;;  %v3278_v6 = vadd.f32 %v1612_v57, %v3134_v9 }
 0xb2c   :  { %v1618_v22 = vpop.f32.mrb[21].mxu1  ;;  %1760 = vrot.lane.b32.xlu0 %v3255_v49, %s2744_s1  ;;  %1766 = vrot.lane.b32.xlu1 %v3258_v0, %s2744_s1  ;;  %v3295_v4 = vadd.f32 %v1616_v59, %v3128_v7  ;;  %v3309_v57 = vpop.permute.xlu1 %1852 }
 0xb2d   :  { %v3288_v14 = vadd.f32 %v1618_v22, %v3128_v7  ;;  %v1847_v22 = vpop.permute.xlu0 %1846 }
 0xb2f   :  { %v1622_v62 = vpop.f32.mrb[22].mxu1  ;;  %3555 = vst [vmem:[#allocation20_spill] sm:$0xff] %v3288_v14 }
 0xb30   :  { %v1624_v3 = vpop.f32.mrb[23].mxu1  ;;  %1762 = vrot.lane.b32.xlu0 %v3265_v45, %s2744_s1  ;;  %1788 = vrot.lane.b32.xlu1 %v3268_v50, %s2744_s1  ;;  %v3305_v9 = vadd.f32 %v1622_v62, %v3140_v12  ;;  %v3311_v7 = vpop.permute.xlu1 %1854 }
 0xb31   :  { %v3298_v15 = vadd.f32 %v1624_v3, %v3140_v12  ;;  %v3318_v37 = vpop.permute.xlu0 %1850 }
 0xb33   :  { %3556 = vst [vmem:[#allocation21_spill] sm:$0xff] %v3298_v15 }
 0xb34   :  { %1774 = vrot.lane.b32.xlu0 %v3278_v6, %s2744_s1  ;;  %1768 = vrot.lane.b32.xlu1 %v3275_v47, %s2744_s1  ;;  %v3313_v58 = vpop.permute.xlu1 %1856 }
 0xb38   :  { %1772 = vrot.lane.b32.xlu1 %v3285_v5, %s2744_s1  ;;  %1780 = vrot.lane.b32.xlu0 %v3288_v14, %s2744_s1  ;;  %v3315_v59 = vpop.permute.xlu1 %1858 }
 0xb3c   :  { %1786 = vrot.lane.b32.xlu0 %v3298_v15, %s2744_s1  ;;  %1778 = vrot.lane.b32.xlu1 %v3295_v4, %s2744_s1 }
 0xb40   :  { %1784 = vrot.lane.b32.xlu1 %v3305_v9, %s2744_s1 }
 0xb86   :  { %v1753_v3 = vpop.permute.xlu1 %1752 }
 0xb87   :  { %v1827_v2 = vmax.f32 %v3205_v46, %v1753_v3 }
 0xb89   :  { %v1958_v12 = vmul.f32 %v3144_v13, %v1827_v2  ;;  %v2227_v44 = vmul.f32 %v3159_v23, %v1827_v2 }
 0xb8a   :  { %v1759_v62 = vpop.permute.xlu1 %1758 }
 0xb8b   :  { %v1830_v15 = vmax.f32 %v3210_v48, %v1759_v62  ;;  %1987 = vrot.lane.b32.xlu1 %v1958_v12, %s2762_s5 }
 0xb8c   :  { %v1749_v26 = vpop.permute.xlu0 %1748 }
 0xb8d   :  { %v2228_v63 = vmul.f32 %v2214_v33, %v1830_v15  ;;  %v1960_v48 = vmul.f32 %v3146_v16, %v1830_v15 }
 0xb8e   :  { %v1765_v39 = vpop.permute.xlu1 %1764 }
 0xb8f   :  { %v1833_v46 = vmax.f32 %v3218_v56, %v1765_v39  ;;  %2241 = vrot.lane.b32.xlu1 %v2227_v44, %s2763_s6  ;;  %2243 = vrot.lane.b32.xlu0 %v2228_v63, %s2763_s6 }
 0xb91   :  { %v1962_v12 = vmul.f32 %v3138_v1, %v1833_v46  ;;  %v2229_v23 = vmul.f32 %v2215_v17, %v1833_v46 }
 0xb92   :  { %v1755_v14 = vpop.permute.xlu1 %1754  ;;  %v3332_v35 = vpop.permute.xlu0 %1770 }
 0xb93   :  { %v1836_v2 = vmax.f32 %v3228_v61, %v3332_v35  ;;  %1991 = vrot.lane.b32.xlu1 %v1960_v48, %s2762_s5  ;;  %1995 = vrot.lane.b32.xlu0 %v1962_v12, %s2762_s5  ;;  %v2216_v61 = vsel %vm909_vm10, %v3179_v34, %v3173_v30  ;;  %v1936_v30 = vsel %vm1935_vm0, %v3132_v8, %v3144_v13 }
 0xb95   :  { %v1964_v25 = vmul.f32 %v3167_v27, %v1836_v2  ;;  %v2230_v29 = vmul.f32 %v2216_v61, %v1836_v2 }
 0xb96   :  { %v3342_v33 = vpop.permute.xlu1 %1776  ;;  %v1751_v63 = vpop.permute.xlu0 %1750 }
 0xb97   :  { %v1790_v44 = vsel %vm1270_vm11, %v1749_v26, %v1751_v63  ;;  %v1791_v56 = vsel %vm1270_vm11, %v1751_v63, %v1753_v3  ;;  %2245 = vrot.lane.b32.xlu0 %v2229_v23, %s2763_s6  ;;  %1999 = vrot.lane.b32.xlu1 %v1964_v25, %s2762_s5  ;;  %v1839_v46 = vmax.f32 %v3238_v43, %v3342_v33 }
 0xb98   :  { %v1825_v24 = vmax.f32 %v3213_v52, %v1790_v44  ;;  %v1826_v15 = vmax.f32 %v3235_v42, %v1791_v56 }
 0xb99   :  { %v1966_v43 = vmul.f32 %v3175_v31, %v1839_v46 }
 0xb9a   :  { %v2091_v26 = vmul.f32 %v3154_v20, %v1825_v24  ;;  %v3356_v3 = vpop.permute.xlu1 %1782  ;;  %v1757_v48 = vpop.permute.xlu0 %1756  ;;  %v1867_v34 = vmul.f32 %v1847_v22, %v1825_v24  ;;  %v1957_v42 = vmul.f32 %v1936_v30, %v1826_v15  ;;  %v2092_v8 = vmul.f32 %v3154_v20, %v1826_v15 }
 0xb9b   :  { %v1792_v12 = vsel %vm1270_vm11, %v1755_v14, %v1757_v48  ;;  %2247 = vrot.lane.b32.xlu0 %v2230_v29, %s2763_s6  ;;  %v1793_v22 = vsel %vm1270_vm11, %v1757_v48, %v1759_v62  ;;  %v2217_v20 = vsel %vm909_vm10, %v3187_v32, %v3185_v11  ;;  %v1937_v11 = vsel %vm1935_vm0, %v3136_v10, %v3146_v16 }
 0xb9c   :  { %v1828_v52 = vmax.f32 %v3225_v60, %v1792_v12  ;;  %2119 = vrot.lane.b32.xlu1 %v2091_v26, %s2764_s7  ;;  %v1875_v14 = vsel %vm1874_vm12, %v1867_v34, 0.0  ;;  %v1842_v60 = vmax.f32 %v3248_v54, %v3356_v3  ;;  %v2231_v54 = vmul.f32 %v2217_v20, %v1839_v46 }
 0xb9d   :  { %v1829_v62 = vmax.f32 %v3245_v51, %v1793_v22 }
 0xb9e   :  { %v1868_v2 = vmul.f32 %v1849_v53, %v1828_v52  ;;  %v1767_v17 = vpop.permute.xlu1 %1766  ;;  %v1761_v23 = vpop.permute.xlu0 %1760  ;;  %v2093_v53 = vmul.f32 %v3142_v55, %v1828_v52  ;;  %v1968_v29 = vmul.f32 %v3183_v36, %v1842_v60 }
 0xb9f   :  { %1985 = vrot.lane.b32.xlu0 %v1957_v42, %s2762_s5 }
 0xba0   :  { %v1876_v25 = vsel %vm1874_vm12, %v1868_v2, 0.0  ;;  %2003 = vrot.lane.b32.xlu1 %v1966_v43, %s2762_s5 }
 0xba1   :  { %v1877_v13 = vadd.f32 %v1876_v25, %v1875_v14 }
 0xba2   :  { %v3375_v63 = vpop.permute.xlu1 %1788  ;;  %v1763_v44 = vpop.permute.xlu0 %1762 }
 0xba3   :  { %v1794_v56 = vsel %vm1270_vm11, %v1761_v23, %v1763_v44  ;;  %v1795_v61 = vsel %vm1270_vm11, %v1763_v44, %v1765_v39  ;;  %2121 = vrot.lane.b32.xlu0 %v2092_v8, %s2764_s7 }
 0xba4   :  { %v1831_v24 = vmax.f32 %v3255_v49, %v1794_v56  ;;  %2123 = vrot.lane.b32.xlu1 %v2093_v53, %s2764_s7  ;;  %v1832_v15 = vmax.f32 %v3265_v45, %v1795_v61  ;;  %v1959_v49 = vmul.f32 %v1937_v11, %v1829_v62  ;;  %v3563_v11 = vld [vmem:[#allocation14_spill] sm:$0xff] }
 0xba6   :  { %v1869_v26 = vmul.f32 %v3318_v37, %v1831_v24  ;;  %v1769_v39 = vpop.permute.xlu1 %1768  ;;  %v1775_v48 = vpop.permute.xlu0 %1774  ;;  %v1938_v37 = vsel %vm1935_vm0, %v3150_v18, %v3138_v1  ;;  %v1845_v1 = vmax.f32 %v3268_v50, %v3375_v63  ;;  %v2096_v18 = vmul.f32 %v3156_v21, %v1832_v15 }
 0xba7   :  { %v1796_v12 = vsel %vm1270_vm11, %v1767_v17, %v1769_v39  ;;  %2249 = vrot.lane.b32.xlu0 %v2231_v54, %s2763_s6  ;;  %v1961_v46 = vmul.f32 %v1938_v37, %v1832_v15  ;;  %v1797_v2 = vsel %vm1270_vm11, %v1769_v39, %v3332_v35  ;;  %v3558_v54 = vld [vmem:[#allocation20_spill] sm:$0xff] }
 0xba8   :  { %v1878_v32 = vsel %vm1874_vm12, %v1869_v26, 0.0  ;;  %v1834_v51 = vmax.f32 %v3258_v0, %v1796_v12  ;;  %2007 = vrot.lane.b32.xlu1 %v1968_v29, %s2762_s5  ;;  %v2094_v0 = vmul.f32 %v3142_v55, %v1829_v62  ;;  %v1835_v23 = vmax.f32 %v3275_v47, %v1797_v2  ;;  %v3559_v62 = vld [vmem:[#allocation17_spill] sm:$0xff]  ;;  %v3561_v26 = vld [vmem:[#allocation18_spill] sm:$0xff] }
 0xba9   :  { %v1879_v45 = vadd.f32 %v1878_v32, %v1877_v13  ;;  %v2095_v47 = vmul.f32 %v3156_v21, %v1831_v24  ;;  %v3557_v24 = vld [vmem:[#allocation15_spill] sm:$0xff]  ;;  %v1941_v32 = vsel %vm1935_vm0, %v3563_v11, %v3183_v36 }
 0xbaa   :  { %v1773_v30 = vpop.permute.xlu1 %1772  ;;  %v1870_v10 = vmul.f32 %v3309_v57, %v1834_v51  ;;  %v1781_v52 = vpop.permute.xlu0 %1780 }
 0xbab   :  { %v1798_v34 = vsel %vm1270_vm11, %v1773_v30, %v1775_v48  ;;  %1989 = vrot.lane.b32.xlu0 %v1959_v49, %s2762_s5  ;;  %v1801_v44 = vsel %vm1270_vm11, %v1781_v52, %v3356_v3  ;;  %v2097_v3 = vmul.f32 %v3169_v28, %v1834_v51  ;;  %v3564_v49 = vld [vmem:[#allocation21_spill] sm:$0xff] }
 0xbac   :  { %v1837_v16 = vmax.f32 %v3285_v5, %v1798_v34  ;;  %1993 = vrot.lane.b32.xlu1 %v1961_v46, %s2762_s5  ;;  %v2218_v5 = vsel %vm909_vm10, %v3195_v40, %v3197_v41  ;;  %v1880_v55 = vsel %vm1874_vm12, %v1870_v10, 0.0  ;;  %v1799_v40 = vsel %vm1270_vm11, %v1775_v48, %v3342_v33  ;;  %v3565_v46 = vld [vmem:[#allocation16_spill] sm:$0xff] }
 0xbad   :  { %v2232_v17 = vmul.f32 %v2218_v5, %v1842_v60  ;;  %v1881_v13 = vadd.f32 %v1880_v55, %v1879_v45  ;;  %vm1886_vm10 = vcmask 959488   ;;  %v1838_v53 = vmax.f32 %v3278_v6, %v1799_v40 }
 0xbae   :  { %v1871_v42 = vmul.f32 %v3311_v7, %v1837_v16  ;;  %v1779_v43 = vpop.permute.xlu1 %1778  ;;  %v1970_v7 = vmul.f32 %v3191_v38, %v1845_v1  ;;  %v1787_v25 = vpop.permute.xlu0 %1786  ;;  %v2099_v48 = vmul.f32 %v3557_v24, %v1837_v16  ;;  %v1942_v30 = vsel %vm1935_vm0, %v3565_v46, %v3191_v38 }
 0xbaf   :  { %v1800_v57 = vsel %vm1270_vm11, %v1779_v43, %v1781_v52  ;;  %2125 = vrot.lane.b32.xlu0 %v2094_v0, %s2764_s7  ;;  %v2100_v6 = vmul.f32 %v3557_v24, %v1838_v53  ;;  %v1803_v51 = vsel %vm1270_vm11, %v1787_v25, %v3375_v63 }
 0xbb0   :  { %v1840_v50 = vmax.f32 %v3295_v4, %v1800_v57  ;;  %2129 = vrot.lane.b32.xlu1 %v2096_v18, %s2764_s7  ;;  %v1882_v35 = vsel %vm1874_vm12, %v1871_v42, 0.0  ;;  %v1844_v45 = vmax.f32 %v3564_v49, %v1803_v51 }
 0xbb1   :  { %v1883_v22 = vadd.f32 %v1882_v35, %v1881_v13 }
 0xbb2   :  { %v1872_v14 = vmul.f32 %v3313_v58, %v1840_v50  ;;  %v1785_v8 = vpop.permute.xlu1 %1784  ;;  %v2098_v58 = vmul.f32 %v3169_v28, %v1835_v23  ;;  %v3562_v28 = vld [vmem:[#allocation19_spill] sm:$0xff]  ;;  %v2101_v37 = vmul.f32 %v3559_v62, %v1840_v50  ;;  %v1969_v34 = vmul.f32 %v1942_v30, %v1844_v45 }
 0xbb3   :  { %v1802_v41 = vsel %vm1270_vm11, %v1785_v8, %v1787_v25  ;;  %2251 = vrot.lane.b32.xlu0 %v2232_v17, %s2763_s6  ;;  %v2233_v12 = vmul.f32 %v3562_v28, %v1845_v1  ;;  %v2104_v36 = vmul.f32 %v3561_v26, %v1844_v45 }
 0xbb4   :  { %v1884_v4 = vsel %vm1874_vm12, %v1872_v14, 0.0  ;;  %v1843_v60 = vmax.f32 %v3305_v9, %v1802_v41  ;;  %2011 = vrot.lane.b32.xlu1 %v1970_v7, %s2762_s5  ;;  %v1939_v9 = vsel %vm1935_vm0, %v3152_v19, %v3167_v27  ;;  %v3560_v19 = vld [vmem:[#allocation13_spill] sm:$0xff] }
 0xbb5   :  { %v1885_v56 = vadd.f32 %v1884_v4, %v1883_v22  ;;  %v1963_v61 = vmul.f32 %v1939_v9, %v1835_v23  ;;  %v1940_v27 = vsel %vm1935_vm0, %v3560_v19, %v3175_v31 }
 0xbb6   :  { %v1873_v33 = vmul.f32 %v3315_v59, %v1843_v60  ;;  %v1841_v59 = vmax.f32 %v3558_v54, %v1801_v44  ;;  %v1965_v15 = vmul.f32 %v1940_v27, %v1838_v53  ;;  %v2103_v39 = vmul.f32 %v3561_v26, %v1843_v60 }
 0xbb7   :  { %2127 = vrot.lane.b32.xlu0 %v2095_v47, %s2764_s7 }
 0xbb8   :  { %2133 = vrot.lane.b32.xlu1 %v2098_v58, %s2764_s7  ;;  %v1887_v21 = vsel %vm1886_vm10, %v1873_v33, 0.0  ;;  %v2102_v29 = vmul.f32 %v3559_v62, %v1841_v59  ;;  %v1967_v31 = vmul.f32 %v1941_v32, %v1841_v59 }
 0xbb9   :  { %v1888_v20 = vadd.f32 %v1887_v21, %v1885_v56 }
 0xbbb   :  { %1997 = vrot.lane.b32.xlu0 %v1963_v61, %s2762_s5 }
 0xbbc   :  { %2137 = vrot.lane.b32.xlu1 %v2100_v6, %s2764_s7 }
 0xbbf   :  { %2131 = vrot.lane.b32.xlu0 %v2097_v3, %s2764_s7 }
 0xbc0   :  { %2141 = vrot.lane.b32.xlu1 %v2102_v29, %s2764_s7 }
 0xbc3   :  { %2001 = vrot.lane.b32.xlu0 %v1965_v15, %s2762_s5 }
 0xbc4   :  { %2143 = vrot.lane.b32.xlu1 %v2103_v39, %s2764_s7 }
 0xbc7   :  { %2135 = vrot.lane.b32.xlu0 %v2099_v48, %s2764_s7 }
 0xbc8   :  { %2253 = vrot.lane.b32.xlu1 %v2233_v12, %s2763_s6 }
 0xbcb   :  { %2005 = vrot.lane.b32.xlu0 %v1967_v31, %s2762_s5 }
 0xbcf   :  { %2139 = vrot.lane.b32.xlu0 %v2101_v37, %s2764_s7 }
 0xbd3   :  { %2009 = vrot.lane.b32.xlu0 %v1969_v34, %s2762_s5 }
 0xbd7   :  { %2145 = vrot.lane.b32.xlu0 %v2104_v36, %s2764_s7 }
 0xbf6   :  { %1889 = vadd.xlane.f32.xlu0 %v1888_v20 }
 0xbfd   :  { %v1988_v63 = vpop.permute.xlu1 %1987 }
 0xc01   :  { %v2242_v10 = vpop.permute.xlu1 %2241  ;;  %v2244_v16 = vpop.permute.xlu0 %2243 }
 0xc02   :  { %v2262_v32 = vsel %vm2027_vm13, %v2242_v10, 0.0  ;;  %v2263_v31 = vsel %vm2027_vm13, %v2244_v16, 0.0 }
 0xc05   :  { %v1992_v52 = vpop.permute.xlu1 %1991  ;;  %v1996_v0 = vpop.permute.xlu0 %1995 }
 0xc09   :  { %v2000_v1 = vpop.permute.xlu1 %1999  ;;  %v2246_v18 = vpop.permute.xlu0 %2245 }
 0xc0a   :  { %v2265_v34 = vsel %vm2027_vm13, %v2246_v18, 0.0 }
 0xc0d   :  { %v3476_v42 = vpop.permute.xlu0 %2247 }
 0xc0e   :  { %v2120_v43 = vpop.permute.xlu1 %2119 }
 0xc11   :  { %v1986_v2 = vpop.permute.xlu0 %1985 }
 0xc12   :  { %v2004_v38 = vpop.permute.xlu1 %2003  ;;  %v2013_v47 = vsel %vm173_vm3, %v1986_v2, %v1988_v63 }
 0xc13   :  { %v2028_v44 = vsel %vm2027_vm13, %v2013_v47, 0.0 }
 0xc15   :  { %v2122_v57 = vpop.permute.xlu0 %2121 }
 0xc16   :  { %v2124_v5 = vpop.permute.xlu1 %2123  ;;  %v2147_v24 = vsel %vm962_vm9, %v2120_v43, %v2122_v57 }
 0xc17   :  { %v2161_v15 = vsel %vm1874_vm12, %v2147_v24, 0.0 }
 0xc19   :  { %v3478_v55 = vpop.permute.xlu0 %2249 }
 0xc1a   :  { %v2008_v50 = vpop.permute.xlu1 %2007  ;;  %v2269_v18 = vsel %vm2027_vm13, %v3478_v55, 0.0 }
 0xc1d   :  { %v1990_v17 = vpop.permute.xlu0 %1989 }
 0xc1e   :  { %v1994_v7 = vpop.permute.xlu1 %1993  ;;  %v2014_v60 = vsel %vm173_vm3, %v1990_v17, %v1992_v52  ;;  %v2264_v52 = vadd.f32 %v2263_v31, %v2262_v32 }
 0xc1f   :  { %v2029_v58 = vsel %vm2027_vm13, %v2014_v60, 0.0  ;;  %v2015_v33 = vsel %vm173_vm3, %v1994_v7, %v1996_v0 }
 0xc20   :  { %v2030_v56 = vadd.f32 %v2029_v58, %v2028_v44  ;;  %v2031_v61 = vsel %vm2027_vm13, %v2015_v33, 0.0 }
 0xc21   :  { %v2126_v23 = vpop.permute.xlu0 %2125 }
 0xc22   :  { %v2130_v14 = vpop.permute.xlu1 %2129  ;;  %v2148_v9 = vsel %vm962_vm9, %v2124_v5, %v2126_v23  ;;  %v2032_v29 = vadd.f32 %v2031_v61, %v2030_v56 }
 0xc23   :  { %v2162_v3 = vsel %vm1874_vm12, %v2148_v9, 0.0 }
 0xc24   :  { %v2163_v28 = vadd.f32 %v2162_v3, %v2161_v15 }
 0xc25   :  { %v3480_v35 = vpop.permute.xlu0 %2251 }
 0xc26   :  { %v2012_v8 = vpop.permute.xlu1 %2011 }
 0xc29   :  { %v2128_v25 = vpop.permute.xlu0 %2127 }
 0xc2a   :  { %v2134_v41 = vpop.permute.xlu1 %2133  ;;  %v2149_v6 = vsel %vm962_vm9, %v2128_v25, %v2130_v14 }
 0xc2b   :  { %v2164_v26 = vsel %vm1874_vm12, %v2149_v6, 0.0 }
 0xc2c   :  { %v2165_v49 = vadd.f32 %v2164_v26, %v2163_v28 }
 0xc2d   :  { %v1998_v13 = vpop.permute.xlu0 %1997 }
 0xc2e   :  { %v2138_v22 = vpop.permute.xlu1 %2137  ;;  %v2016_v21 = vsel %vm173_vm3, %v1998_v13, %v2000_v1  ;;  %v2267_v1 = vsel %vm2027_vm13, %v3476_v42, 0.0  ;;  %v2271_v42 = vsel %vm2027_vm13, %v3480_v35, 0.0 }
 0xc2f   :  { %v2033_v62 = vsel %vm2027_vm13, %v2016_v21, 0.0 }
 0xc30   :  { %v2034_v12 = vadd.f32 %v2033_v62, %v2032_v29 }
 0xc31   :  { %v2132_v40 = vpop.permute.xlu0 %2131 }
 0xc32   :  { %v2142_v54 = vpop.permute.xlu1 %2141  ;;  %v2150_v19 = vsel %vm962_vm9, %v2132_v40, %v2134_v41 }
 0xc33   :  { %v2166_v51 = vsel %vm1874_vm12, %v2150_v19, 0.0 }
 0xc34   :  { %v2167_v0 = vadd.f32 %v2166_v51, %v2165_v49  ;;  %v2664_v51 = vld [vmem:[#allocation6 + $0x8] sm:$0xff] }
 0xc35   :  { %v2002_v4 = vpop.permute.xlu0 %2001 }
 0xc36   :  { %v2017_v59 = vsel %vm173_vm3, %v2002_v4, %v2004_v38  ;;  %v2144_v46 = vpop.permute.xlu1 %2143  ;;  %v2266_v38 = vadd.f32 %v2265_v34, %v2264_v52 }
 0xc37   :  { %v2035_v39 = vsel %vm2027_vm13, %v2017_v59, 0.0 }
 0xc38   :  { %v2036_v45 = vadd.f32 %v2035_v39, %v2034_v12  ;;  %v2268_v17 = vadd.f32 %v2267_v1, %v2266_v38 }
 0xc39   :  { %v2136_v53 = vpop.permute.xlu0 %2135 }
 0xc3a   :  { %v2151_v11 = vsel %vm962_vm9, %v2136_v53, %v2138_v22  ;;  %v2254_v7 = vpop.permute.xlu1 %2253 }
 0xc3b   :  { %v2168_v36 = vsel %vm1874_vm12, %v2151_v11, 0.0  ;;  %v2273_v40 = vsel %vm2039_vm14, %v2254_v7, 0.0  ;;  %v3566_v11 = vld [vmem:[#allocation12_spill] sm:$0xff] }
 0xc3c   :  { %v2169_v57 = vadd.f32 %v2168_v36, %v2167_v0 }
 0xc3d   :  { %v2006_v20 = vpop.permute.xlu0 %2005 }
 0xc3e   :  { %v2018_v27 = vsel %vm173_vm3, %v2006_v20, %v2008_v50 }
 0xc3f   :  { %v2037_v37 = vsel %vm2027_vm13, %v2018_v27, 0.0 }
 0xc40   :  { %v2038_v10 = vadd.f32 %v2037_v37, %v2036_v45 }
 0xc41   :  { %v2140_v48 = vpop.permute.xlu0 %2139 }
 0xc42   :  { %v2152_v30 = vsel %vm962_vm9, %v2140_v48, %v2142_v54 }
 0xc43   :  { %v2170_v43 = vsel %vm1874_vm12, %v2152_v30, 0.0 }
 0xc44   :  { %v2171_v23 = vadd.f32 %v2170_v43, %v2169_v57 }
 0xc45   :  { %v2010_v63 = vpop.permute.xlu0 %2009 }
 0xc46   :  { %v2019_v16 = vsel %vm173_vm3, %v2010_v63, %v2012_v8  ;;  %v2270_v8 = vadd.f32 %v2269_v18, %v2268_v17  ;;  %vm2068_vm3 = vcmask 0  }
 0xc47   :  { %v2040_v2 = vsel %vm2039_vm14, %v2019_v16, 0.0 }
 0xc48   :  { %v2041_v5 = vadd.f32 %v2040_v2, %v2038_v10  ;;  %v2272_v41 = vadd.f32 %v2271_v42, %v2270_v8 }
 0xc49   :  { %v2146_v50 = vpop.permute.xlu0 %2145 }
 0xc4a   :  { %v2153_v14 = vsel %vm962_vm9, %v2144_v46, %v2146_v50  ;;  %2042 = vadd.xlane.f32.xlu1 %v2041_v5  ;;  %v2274_v4 = vadd.f32 %v2273_v40, %v2272_v41 }
 0xc4b   :  { %v2172_v25 = vsel %vm1886_vm10, %v2153_v14, 0.0 }
 0xc4c   :  { %v2173_v13 = vadd.f32 %v2172_v25, %v2171_v23 }
 0xc4e   :  { %2174 = vadd.xlane.f32.xlu0 %v2173_v13 }
 0xc52   :  { %2275 = vadd.xlane.f32.xlu0 %v2274_v4 }
 0xc83   :  { %v1890_v55 = vpop.xlane.xlu0 %1889 }
 0xc84   :  { %v1891_v60 = vrot.slane %v1890_v55, 4 }
 0xc86   :  { %v1892_v47 = vadd.f32 %v1891_v60, %v1890_v55 }
 0xc88   :  { %v1893_v22 = vrot.slane %v1892_v47, 2 }
 0xc8a   :  { %v1894_v58 = vadd.f32 %v1893_v22, %v1892_v47 }
 0xc8c   :  { %v1895_v53 = vrot.slane %v1894_v58, 1 }
 0xc8e   :  { %v1896_v33 = vadd.f32 %v1895_v53, %v1894_v58 }
 0xc90   :  { %2592 = vpush %v1896_v33 }
 0xcc1   :  { %s2593_s8 = spop %2592 }
 0xcc2   :  { %v1898_v49 = vstv %s2593_s8 }
 0xcc3   :  { %v1899_v45 = vadd.f32 %v2664_v51, %v1898_v49 }
 0xcd7   :  { %v2043_v44 = vpop.xlane.xlu1 %2042 }
 0xcd8   :  { %v2044_v35 = vrot.slane %v2043_v44, 4 }
 0xcda   :  { %v2045_v56 = vadd.f32 %v2044_v35, %v2043_v44 }
 0xcdb   :  { %v2175_v9 = vpop.xlane.xlu0 %2174 }
 0xcdc   :  { %v2046_v21 = vrot.slane %v2045_v56, 2  ;;  %v2176_v61 = vrot.slane %v2175_v9, 4 }
 0xcde   :  { %v2177_v20 = vadd.f32 %v2176_v61, %v2175_v9  ;;  %v2047_v24 = vadd.f32 %v2046_v21, %v2045_v56 }
 0xcdf   :  { %v2276_v6 = vpop.xlane.xlu0 %2275 }
 0xce0   :  { %v2178_v54 = vrot.slane %v2177_v20, 2  ;;  %v2277_v59 = vrot.slane %v2276_v6, 4  ;;  %v2048_v3 = vrot.slane %v2047_v24, 1 }
 0xce2   :  { %v2278_v62 = vadd.f32 %v2277_v59, %v2276_v6  ;;  %v2049_v29 = vadd.f32 %v2048_v3, %v2047_v24  ;;  %v2179_v19 = vadd.f32 %v2178_v54, %v2177_v20 }
 0xce4   :  { %v2279_v27 = vrot.slane %v2278_v62, 2  ;;  %2594 = vpush %v2049_v29  ;;  %v2180_v15 = vrot.slane %v2179_v19, 1 }
 0xce6   :  { %v2181_v26 = vadd.f32 %v2180_v15, %v2179_v19  ;;  %v2280_v39 = vadd.f32 %v2279_v27, %v2278_v62 }
 0xce8   :  { %2596 = vpush %v2181_v26  ;;  %v2281_v48 = vrot.slane %v2280_v39, 1 }
 0xcea   :  { %v2282_v28 = vadd.f32 %v2281_v48, %v2280_v39 }
 0xcec   :  { %2598 = vpush %v2282_v28 }
 0xd15   :  { %s2595_s9 = spop %2594 }
 0xd16   :  { %v2051_v12 = vstv %s2595_s9 }
 0xd17   :  { %v2052_v32 = vadd.f32 %v2051_v12, %v3566_v11 }
 0xd19   :  { %2054 = vrot.lane.b32.xlu1 %v2052_v32, %s2754_s25  ;;  %s2597_s10 = spop %2596 }
 0xd1a   :  { %v2183_v36 = vstv %s2597_s10 }
 0xd1b   :  { %v2184_v63 = vadd.f32 %v2664_v51, %v2183_v36 }
 0xd1d   :  { %s2599_s11 = spop %2598 }
 0xd1e   :  { %v2284_v31 = vstv %s2599_s11 }
 0xd1f   :  { %v2285_v37 = vadd.f32 %v2664_v51, %v2284_v31 }
 0xd21   :  { %2287 = vrot.lane.b32.xlu0 %v2285_v37, %s2754_s25 }
 0xd8b   :  { %v2055_v46 = vpop.permute.xlu1 %2054 }
 0xd8c   :  { %v2057_v30 = vmul.f32 %v2055_v46, %v1899_v45 }
 0xd8e   :  { %v2370_v34 = vmul.f32 -1.442695, %v2057_v30 }
 0xd90   :  { %2656 = vpow2.f32 %v2370_v34 }
 0xd93   :  { %v2288_v52 = vpop.permute.xlu0 %2287 }
 0xd94   :  { %v2290_v0 = vmul.f32 %v2288_v52, %v2184_v63 }
 0xd96   :  { %v2371_v10 = vmul.f32 -1.442695, %v2290_v0 }
 0xd98   :  { %2658 = vpow2.f32 %v2371_v10 }
 0xd9a   :  { %v2657_v16 = vpop.eup %2656 }
 0xd9b   :  { %v2061_v1 = vadd.f32 1.0, %v2657_v16 }
 0xd9d   :  { %2660 = vrcp.f32 %v2061_v1 }
 0xda2   :  { %v2659_v43 = vpop.eup %2658 }
 0xda3   :  { %v2294_v2 = vadd.f32 1.0, %v2659_v43 }
 0xda5   :  { %2662 = vrcp.f32 %v2294_v2 }
 0xda7   :  { %v2661_v38 = vpop.eup %2660 }
 0xda8   :  { %2065 = vrot.lane.b32.xlu1 %v2661_v38, %s2765_s12 }
 0xdaf   :  { %v2663_v57 = vpop.eup %2662 }
 0xdb0   :  { %2298 = vrot.lane.b32.xlu1 %v2663_v57, %s2763_s6 }
 0xe1a   :  { %v2066_v5 = vpop.permute.xlu1 %2065 }
 0xe1b   :  { %2069 = vst.msk [vmem:[#allocation8] sm:$0x1] %vm2068_vm3, %v2066_v5 }
 0xe22   :  { %v2299_v18 = vpop.permute.xlu1 %2298 }
 0xe23   :  { %2302 = vst.msk [vmem:[#allocation8] sm:$0x1] %vm2301_vm15, %v2299_v18 }
 0xe24   :  { %2720 = shalt.err (!%p2717_p6)
}
 0xe25   :  { %s2721_s1 = scalar_lea.hbm %s3540_s4, 16 }
 0xe26   :  { %p2722_p7 = scmp.ne.s32.totalorder %s3540_s4, %s2721_s1  ;;  %p2725_p8 = scmp.lt.u32.totalorder %s2721_s1, %s3540_s4 }
 0xe28   :  { %p2727_p9 = pnand %p2725_p8, %p2722_p7 }
 0xe2a   :  { %2730 = shalt.err (!%p2727_p9)
}
 0xe2b   :  { %2312 = dma.vmem_to_hbm [thread:$0]  %s2310_s13, 16, %s3540_s4, [#allocation5]  }
 0xe2c   :  { %2735 = dma.done.wait [#allocation5], 16  }
 0xe2d   :  { %2736 = vsyncadd [#allocation5], 4294967280 }
 0xe2e   :  { %2316 = vsyncpa [#allocation4], 1 }
 0xe2f   :  { %2317 = vsyncpa [#allocation7], 1 }
 0xe30   :  { %2318 = vsyncpa [#allocation5], 1 }

</bundles_post_ra>
